<compile_context>
chip_gen: v7x
topology: tpu7x:2x2x1
jax: 0.10.0
libtpu: 0.0.40
codegen_flags: <defaults>
</compile_context>

<pallas_src>
import math
import functools

import jax
import jax.numpy as jnp
from jax import lax
from jax.experimental import pallas as pl
from jax.experimental.pallas import tpu as pltpu


# ----------------------------------------------------------------------------
# Pallas kernel
# ----------------------------------------------------------------------------

def _shift_rows(x, amounts, nbits, direction):
    """Shift row i of x by amounts[i] lanes (left if direction<0 else right),
    filling vacated lanes with zeros.  Implemented as log2 conditional static
    shifts: static lane slice + concat + select (all Mosaic-friendly ops)."""
    rows, width = x.shape
    for b in range(nbits):
        k = 1 << b
        if direction < 0:   # left shift: drop k leading cols, zero-fill the tail
            shifted = jnp.concatenate(
                [x[:, k:], jnp.zeros((rows, k), x.dtype)], axis=1)
        else:               # right shift: zero-fill the head, drop k trailing cols
            shifted = jnp.concatenate(
                [jnp.zeros((rows, k), x.dtype), x[:, :width - k]], axis=1)
        x = jnp.where((amounts & k) > 0, shifted, x)
    return x


def _fused_rel_mha_kernel(x_ref, c_ref, wq_ref, wkv_ref, bq_ref, bkv_ref,
                          wo_ref, bo_ref, uk_ref, uv_ref, mask_ref, out_ref,
                          *, num_heads, scale):
    C, T = x_ref.shape                    # x_ref/c_ref: [C, T] (native NCT block)
    Dk = C // num_heads
    N = uk_ref.shape[0]                   # 2*T - 1
    nbits = max(1, (T - 1).bit_length())

    x = x_ref[...]
    cc = c_ref[...]

    # 1x1-conv projections on the MXU; K and V share the fused [2C, C] weight.
    q = jnp.dot(wq_ref[...], x,
                preferred_element_type=jnp.float32).T + bq_ref[...]    # [T, C]
    kv = jnp.dot(wkv_ref[...], cc,
                 preferred_element_type=jnp.float32).T + bkv_ref[...]  # [T, 2C]
    k = kv[:, :C]
    v = kv[:, C:]

    uk = uk_ref[...]                      # [2T-1, Dk] relative key table
    uv = uv_ref[...]                      # [2T-1, Dk] relative value table
    mask = mask_ref[...]                  # [T, T]

    row = lax.broadcasted_iota(jnp.int32, (T, 1), 0)
    amounts = (T - 1) - row               # per-query-row skew amount

    nt = (((1,), (1,)), ((), ()))         # "NT" matmul dimension numbers
    head_outs = []
    for h in range(num_heads):
        qh = q[:, h * Dk:(h + 1) * Dk]    # [T, Dk]
        kh = k[:, h * Dk:(h + 1) * Dk]
        vh = v[:, h * Dk:(h + 1) * Dk]

        # content scores (MXU)
        s = lax.dot_general(qh, kh, nt, preferred_element_type=jnp.float32)   # [T, T]
        # relative-key logits against the un-gathered table (MXU), then the
        # relative->absolute skew: abs[i, j] = rel[i, T-1 + j - i].
        rel = lax.dot_general(qh, uk, nt, preferred_element_type=jnp.float32)  # [T, 2T-1]
        rel_abs = _shift_rows(rel, amounts, nbits, direction=-1)[:, :T]        # [T, T]

        s = (s + rel_abs) * scale
        s = jnp.where(mask == 0, -10000.0, s)

        # softmax over keys
        m = jnp.max(s, axis=-1, keepdims=True)
        e = jnp.exp(s - m)
        p = e * pl.reciprocal(jnp.sum(e, axis=-1, keepdims=True), approx=False)

        # content values (MXU)
        o = jnp.dot(p, vh, preferred_element_type=jnp.float32)                 # [T, Dk]
        # absolute->relative skew of p, then MXU matmul with the value table:
        # p_rel[i, r] = p[i, r - (T-1) + i] (zero outside range).
        p_pad = jnp.concatenate(
            [p, jnp.zeros((T, N - T), p.dtype)], axis=1)                       # [T, 2T-1]
        p_rel = _shift_rows(p_pad, amounts, nbits, direction=+1)
        o = o + jnp.dot(p_rel, uv, preferred_element_type=jnp.float32)         # [T, Dk]
        head_outs.append(o)

    o_all = jnp.concatenate(head_outs, axis=1)                                 # [T, C]
    # fused 1x1 output projection straight back into the native [Cout, T] layout
    y = lax.dot_general(wo_ref[...], o_all, nt,
                        preferred_element_type=jnp.float32) + bo_ref[...]      # [Cout, T]
    out_ref[...] = y.astype(out_ref.dtype)


# ----------------------------------------------------------------------------
# Parameter prep / wrapper (plain JAX, parameters only — no activation work)
# ----------------------------------------------------------------------------

def get_relative_embeddings(emb, length, window):
    """emb: [n_heads_rel, 2*window+1, Dk] -> [n_heads_rel, 2*length-1, Dk]."""
    pad_length = max(length - (window + 1), 0)
    slice_start = max(window + 1 - length, 0)
    slice_end = slice_start + 2 * length - 1
    if pad_length > 0:
        emb = jnp.pad(emb, ((0, 0), (pad_length, pad_length), (0, 0)))
    return emb[:, slice_start:slice_end]


def rel_mha_forward(x, c, attn_mask, params, num_heads, rel_window):
    """x, c: [B, C, T]; attn_mask: [B, 1, T, T]; returns [B, C_out, T]."""
    B, C, T = x.shape
    Cout = params["wo"].shape[0]
    Dk = C // num_heads
    N = 2 * T - 1
    scale = 1.0 / math.sqrt(Dk)

    # heads_share=True -> single shared relative table
    used_k = get_relative_embeddings(params["emb_rel_k"], T, rel_window)[0]   # [2T-1, Dk]
    used_v = get_relative_embeddings(params["emb_rel_v"], T, rel_window)[0]

    # fuse K/V projection weights (shared input c); biases reshaped for broadcast
    wkv = jnp.concatenate([params["wk"], params["wv"]], axis=0)               # [2C, C]
    bq = params["bq"].reshape(1, C)
    bkv = jnp.concatenate([params["bk"], params["bv"]], axis=0).reshape(1, 2 * C)
    bo = params["bo"].reshape(Cout, 1)

    kernel = functools.partial(_fused_rel_mha_kernel,
                               num_heads=num_heads, scale=scale)
    return pl.pallas_call(
        kernel,
        out_shape=jax.ShapeDtypeStruct((B, Cout, T), x.dtype),
        grid=(B,),
        in_specs=[
            pl.BlockSpec((None, C, T), lambda i: (i, 0, 0)),          # x
            pl.BlockSpec((None, C, T), lambda i: (i, 0, 0)),          # c
            pl.BlockSpec((C, C), lambda i: (0, 0)),                   # wq
            pl.BlockSpec((2 * C, C), lambda i: (0, 0)),               # wkv
            pl.BlockSpec((1, C), lambda i: (0, 0)),                   # bq
            pl.BlockSpec((1, 2 * C), lambda i: (0, 0)),               # bkv
            pl.BlockSpec((Cout, C), lambda i: (0, 0)),                # wo
            pl.BlockSpec((Cout, 1), lambda i: (0, 0)),                # bo
            pl.BlockSpec((N, Dk), lambda i: (0, 0)),                  # used_k
            pl.BlockSpec((N, Dk), lambda i: (0, 0)),                  # used_v
            pl.BlockSpec((None, None, T, T), lambda i: (i, 0, 0, 0)),  # mask
        ],
        out_specs=pl.BlockSpec((None, Cout, T), lambda i: (i, 0, 0)),
        compiler_params=pltpu.CompilerParams(dimension_semantics=("parallel",)),
    )(x, c, params["wq"], wkv, bq, bkv, params["wo"], bo, used_k, used_v,
      attn_mask)


# ----------------------------------------------------------------------------
# Pure-JAX reference (PyTorch semantics, for the correctness check)
# ----------------------------------------------------------------------------

def reference_forward(x, c, mask, params, H, W):
    B, C, T = x.shape
    Dk = C // H
    scale = 1.0 / math.sqrt(Dk)

    def conv(inp, w, b):
        return jnp.einsum("oc,bct->bot", w, inp) + b[None, :, None]

    q = conv(x, params["wq"], params["bq"])
    k = conv(c, params["wk"], params["bk"])
    v = conv(c, params["wv"], params["bv"])
    qh = jnp.transpose(q.reshape(B, H, Dk, T), (0, 1, 3, 2))
    kh = jnp.transpose(k.reshape(B, H, Dk, T), (0, 1, 3, 2))
    vh = jnp.transpose(v.reshape(B, H, Dk, T), (0, 1, 3, 2))
    scores = jnp.einsum("bhtd,bhsd->bhts", qh, kh) * scale
    used_k = get_relative_embeddings(params["emb_rel_k"], T, W)[0]
    used_v = get_relative_embeddings(params["emb_rel_v"], T, W)[0]
    idx = (T - 1) + jnp.arange(T)[None, :] - jnp.arange(T)[:, None]
    ek, ev = used_k[idx], used_v[idx]
    scores = scores + jnp.einsum("bhtd,tsd->bhts", qh, ek) * scale
    scores = jnp.where(mask == 0, -10000.0, scores)
    p = jax.nn.softmax(scores, axis=-1)
    out = jnp.einsum("bhts,bhsd->bhtd", p, vh) + jnp.einsum("bhts,tsd->bhtd", p, ev)
    out = jnp.transpose(out, (0, 1, 3, 2)).reshape(B, C, T)
    return conv(out, params["wo"], params["bo"])


# ----------------------------------------------------------------------------
# Deterministic parameter init + demo
# ----------------------------------------------------------------------------

def init_params(key, channels, out_channels, num_heads, rel_window):
    Dk = channels // num_heads
    ks = jax.random.split(key, 10)

    def xavier(k, c_out, c_in):
        bound = math.sqrt(6.0 / (c_in + c_out))
        return jax.random.uniform(k, (c_out, c_in), jnp.float32, -bound, bound)

    def bias(k, c_out, c_in):
        bound = 1.0 / math.sqrt(c_in)
        return jax.random.uniform(k, (c_out,), jnp.float32, -bound, bound)

    rel_std = Dk ** -0.5
    return {
        "wq": xavier(ks[0], channels, channels), "bq": bias(ks[1], channels, channels),
        "wk": xavier(ks[2], channels, channels), "bk": bias(ks[3], channels, channels),
        "wv": xavier(ks[4], channels, channels), "bv": bias(ks[5], channels, channels),
        "wo": xavier(ks[6], out_channels, channels), "bo": bias(ks[7], out_channels, channels),
        # heads_share=True -> n_heads_rel = 1
        "emb_rel_k": jax.random.normal(ks[8], (1, 2 * rel_window + 1, Dk), jnp.float32) * rel_std,
        "emb_rel_v": jax.random.normal(ks[9], (1, 2 * rel_window + 1, Dk), jnp.float32) * rel_std,
    }


if __name__ == "__main__":
    B, channels, out_channels, num_heads, T, window = 2, 32, 32, 4, 16, 4

    key = jax.random.PRNGKey(0)
    kx, kc, kp = jax.random.split(key, 3)
    x = jax.random.normal(kx, (B, channels, T), jnp.float32)   # [B, C, T]
    c = jax.random.normal(kc, (B, channels, T), jnp.float32)   # [B, C, T]
    attn_mask = jnp.ones((B, 1, T, T), jnp.float32)            # [B, 1, T, T]

    params = init_params(kp, channels, out_channels, num_heads, window)

    y = rel_mha_forward(x, c, attn_mask, params, num_heads, window)
    y = jax.block_until_ready(y)

    y_ref = reference_forward(x, c, attn_mask, params, num_heads, window)
    assert y.shape == (B, out_channels, T)
    assert jnp.allclose(y, y_ref, rtol=1e-4, atol=2e-4), "mismatch vs reference"

    print("KERNEL_OK")
</pallas_src>

<mosaic_0001>
module attributes {stable_mosaic.version = 11 : i64} {
  func.func @_fused_rel_mha_kernel(%arg0: i32, %arg1: memref<1x32x16xf32, #tpu.memory_space<vmem>>, %arg2: memref<1x32x16xf32, #tpu.memory_space<vmem>>, %arg3: memref<32x32xf32, #tpu.memory_space<vmem>>, %arg4: memref<64x32xf32, #tpu.memory_space<vmem>>, %arg5: memref<1x32xf32, #tpu.memory_space<vmem>>, %arg6: memref<1x64xf32, #tpu.memory_space<vmem>>, %arg7: memref<32x32xf32, #tpu.memory_space<vmem>>, %arg8: memref<32x1xf32, #tpu.memory_space<vmem>>, %arg9: memref<31x8xf32, #tpu.memory_space<vmem>>, %arg10: memref<31x8xf32, #tpu.memory_space<vmem>>, %arg11: memref<1x1x16x16xf32, #tpu.memory_space<vmem>>, %arg12: memref<1x32x16xf32, #tpu.memory_space<vmem>>) attributes {dimension_semantics = [#tpu.dimension_semantics<parallel>], iteration_bounds = array<i64: 2>, scalar_prefetch = 0 : i64, scratch_operands = 0 : i64, tpu.core_type = #tpu.core_type<tc>, window_params = [{transform_indices = @transform_0, window_bounds = array<i64: 1, 32, 16>}, {transform_indices = @transform_1, window_bounds = array<i64: 1, 32, 16>}, {pipeline_mode = #tpu.pipeline_mode<synchronous>, transform_indices = @transform_2, window_bounds = array<i64: 32, 32>}, {pipeline_mode = #tpu.pipeline_mode<synchronous>, transform_indices = @transform_3, window_bounds = array<i64: 64, 32>}, {pipeline_mode = #tpu.pipeline_mode<synchronous>, transform_indices = @transform_4, window_bounds = array<i64: 1, 32>}, {pipeline_mode = #tpu.pipeline_mode<synchronous>, transform_indices = @transform_5, window_bounds = array<i64: 1, 64>}, {pipeline_mode = #tpu.pipeline_mode<synchronous>, transform_indices = @transform_6, window_bounds = array<i64: 32, 32>}, {pipeline_mode = #tpu.pipeline_mode<synchronous>, transform_indices = @transform_7, window_bounds = array<i64: 32, 1>}, {pipeline_mode = #tpu.pipeline_mode<synchronous>, transform_indices = @transform_8, window_bounds = array<i64: 31, 8>}, {pipeline_mode = #tpu.pipeline_mode<synchronous>, transform_indices = @transform_9, window_bounds = array<i64: 31, 8>}, {transform_indices = @transform_10, window_bounds = array<i64: 1, 1, 16, 16>}, {transform_indices = @transform_11, window_bounds = array<i64: 1, 32, 16>}]} {
    %c0 = arith.constant 0 : index
    %c0_0 = arith.constant 0 : index
    %c0_1 = arith.constant 0 : index
    %0 = vector.load %arg1[%c0, %c0_0, %c0_1] : memref<1x32x16xf32, #tpu.memory_space<vmem>>, vector<1x32x16xf32>
    %1 = vector.shape_cast %0 : vector<1x32x16xf32> to vector<32x16xf32>
    %c0_2 = arith.constant 0 : index
    %c0_3 = arith.constant 0 : index
    %c0_4 = arith.constant 0 : index
    %2 = vector.load %arg2[%c0_2, %c0_3, %c0_4] : memref<1x32x16xf32, #tpu.memory_space<vmem>>, vector<1x32x16xf32>
    %3 = vector.shape_cast %2 : vector<1x32x16xf32> to vector<32x16xf32>
    %c0_5 = arith.constant 0 : index
    %c0_6 = arith.constant 0 : index
    %4 = vector.load %arg3[%c0_5, %c0_6] : memref<32x32xf32, #tpu.memory_space<vmem>>, vector<32x32xf32>
    %cst = arith.constant dense<0.000000e+00> : vector<32x16xf32>
    %5 = tpu.matmul %4, %1, %cst {dimension_numbers = #tpu.dot_dimension_numbers<[1], [0], [0], [1], [0, 0, 1, 1], [], []>} : vector<32x32xf32>, vector<32x16xf32>, vector<32x16xf32> -> vector<32x16xf32>
    %6 = tpu.transpose %5, [1, 0] : vector<32x16xf32> -> vector<16x32xf32>
    %c0_7 = arith.constant 0 : index
    %c0_8 = arith.constant 0 : index
    %7 = vector.load %arg5[%c0_7, %c0_8] : memref<1x32xf32, #tpu.memory_space<vmem>>, vector<1x32xf32>
    %8 = vector.broadcast %7 : vector<1x32xf32> to vector<16x32xf32>
    %9 = arith.addf %6, %8 : vector<16x32xf32>
    %c0_9 = arith.constant 0 : index
    %c0_10 = arith.constant 0 : index
    %10 = vector.load %arg4[%c0_9, %c0_10] : memref<64x32xf32, #tpu.memory_space<vmem>>, vector<64x32xf32>
    %cst_11 = arith.constant dense<0.000000e+00> : vector<64x16xf32>
    %11 = tpu.matmul %10, %3, %cst_11 {dimension_numbers = #tpu.dot_dimension_numbers<[1], [0], [0], [1], [0, 0, 1, 1], [], []>} : vector<64x32xf32>, vector<32x16xf32>, vector<64x16xf32> -> vector<64x16xf32>
    %12 = tpu.transpose %11, [1, 0] : vector<64x16xf32> -> vector<16x64xf32>
    %c0_12 = arith.constant 0 : index
    %c0_13 = arith.constant 0 : index
    %13 = vector.load %arg6[%c0_12, %c0_13] : memref<1x64xf32, #tpu.memory_space<vmem>>, vector<1x64xf32>
    %14 = vector.broadcast %13 : vector<1x64xf32> to vector<16x64xf32>
    %15 = arith.addf %12, %14 : vector<16x64xf32>
    %16 = vector.extract_strided_slice %15 {offsets = [0, 0], sizes = [16, 32], strides = [1, 1]} : vector<16x64xf32> to vector<16x32xf32>
    %17 = vector.extract_strided_slice %15 {offsets = [0, 32], sizes = [16, 32], strides = [1, 1]} : vector<16x64xf32> to vector<16x32xf32>
    %c0_14 = arith.constant 0 : index
    %c0_15 = arith.constant 0 : index
    %18 = vector.load %arg9[%c0_14, %c0_15] : memref<31x8xf32, #tpu.memory_space<vmem>>, vector<31x8xf32>
    %c0_16 = arith.constant 0 : index
    %c0_17 = arith.constant 0 : index
    %19 = vector.load %arg10[%c0_16, %c0_17] : memref<31x8xf32, #tpu.memory_space<vmem>>, vector<31x8xf32>
    %c0_18 = arith.constant 0 : index
    %c0_19 = arith.constant 0 : index
    %c0_20 = arith.constant 0 : index
    %c0_21 = arith.constant 0 : index
    %20 = vector.load %arg11[%c0_18, %c0_19, %c0_20, %c0_21] : memref<1x1x16x16xf32, #tpu.memory_space<vmem>>, vector<1x1x16x16xf32>
    %21 = vector.shape_cast %20 : vector<1x1x16x16xf32> to vector<16x16xf32>
    %22 = tpu.iota {dimensions = array<i32: 0>} : vector<16x1xi32>
    %c15_i32 = arith.constant 15 : i32
    %23 = vector.broadcast %c15_i32 : i32 to vector<16x1xi32>
    %24 = arith.subi %23, %22 : vector<16x1xi32>
    %25 = vector.extract_strided_slice %9 {offsets = [0, 0], sizes = [16, 8], strides = [1, 1]} : vector<16x32xf32> to vector<16x8xf32>
    %26 = vector.extract_strided_slice %16 {offsets = [0, 0], sizes = [16, 8], strides = [1, 1]} : vector<16x32xf32> to vector<16x8xf32>
    %27 = vector.extract_strided_slice %17 {offsets = [0, 0], sizes = [16, 8], strides = [1, 1]} : vector<16x32xf32> to vector<16x8xf32>
    %cst_22 = arith.constant dense<0.000000e+00> : vector<16x16xf32>
    %28 = tpu.matmul %25, %26, %cst_22 {dimension_numbers = #tpu.dot_dimension_numbers<[1], [1], [0], [0], [0, 0, 1, 0], [], []>} : vector<16x8xf32>, vector<16x8xf32>, vector<16x16xf32> -> vector<16x16xf32>
    %cst_23 = arith.constant dense<0.000000e+00> : vector<16x31xf32>
    %29 = tpu.matmul %25, %18, %cst_23 {dimension_numbers = #tpu.dot_dimension_numbers<[1], [1], [0], [0], [0, 0, 1, 0], [], []>} : vector<16x8xf32>, vector<31x8xf32>, vector<16x31xf32> -> vector<16x31xf32>
    %30 = vector.extract_strided_slice %29 {offsets = [0, 1], sizes = [16, 30], strides = [1, 1]} : vector<16x31xf32> to vector<16x30xf32>
    %cst_24 = arith.constant 0.000000e+00 : f32
    %31 = vector.broadcast %cst_24 : f32 to vector<16x1xf32>
    %32 = tpu.concatenate %30, %31 in 1 : vector<16x30xf32>, vector<16x1xf32> -> vector<16x31xf32>
    %c1_i32 = arith.constant 1 : i32
    %33 = vector.broadcast %c1_i32 : i32 to vector<16x1xi32>
    %34 = arith.andi %24, %33 : vector<16x1xi32>
    %c0_i32 = arith.constant 0 : i32
    %35 = vector.broadcast %c0_i32 : i32 to vector<16x1xi32>
    %36 = arith.cmpi sgt, %34, %35 : vector<16x1xi32>
    %37 = vector.shape_cast %36 : vector<16x1xi1> to vector<16x1xi1>
    %38 = vector.broadcast %37 : vector<16x1xi1> to vector<16x31xi1>
    %39 = arith.select %38, %32, %29 : vector<16x31xi1>, vector<16x31xf32>
    %40 = vector.extract_strided_slice %39 {offsets = [0, 2], sizes = [16, 29], strides = [1, 1]} : vector<16x31xf32> to vector<16x29xf32>
    %cst_25 = arith.constant 0.000000e+00 : f32
    %41 = vector.broadcast %cst_25 : f32 to vector<16x2xf32>
    %42 = tpu.concatenate %40, %41 in 1 : vector<16x29xf32>, vector<16x2xf32> -> vector<16x31xf32>
    %c2_i32 = arith.constant 2 : i32
    %43 = vector.broadcast %c2_i32 : i32 to vector<16x1xi32>
    %44 = arith.andi %24, %43 : vector<16x1xi32>
    %c0_i32_26 = arith.constant 0 : i32
    %45 = vector.broadcast %c0_i32_26 : i32 to vector<16x1xi32>
    %46 = arith.cmpi sgt, %44, %45 : vector<16x1xi32>
    %47 = vector.shape_cast %46 : vector<16x1xi1> to vector<16x1xi1>
    %48 = vector.broadcast %47 : vector<16x1xi1> to vector<16x31xi1>
    %49 = arith.select %48, %42, %39 : vector<16x31xi1>, vector<16x31xf32>
    %50 = vector.extract_strided_slice %49 {offsets = [0, 4], sizes = [16, 27], strides = [1, 1]} : vector<16x31xf32> to vector<16x27xf32>
    %cst_27 = arith.constant 0.000000e+00 : f32
    %51 = vector.broadcast %cst_27 : f32 to vector<16x4xf32>
    %52 = tpu.concatenate %50, %51 in 1 : vector<16x27xf32>, vector<16x4xf32> -> vector<16x31xf32>
    %c4_i32 = arith.constant 4 : i32
    %53 = vector.broadcast %c4_i32 : i32 to vector<16x1xi32>
    %54 = arith.andi %24, %53 : vector<16x1xi32>
    %c0_i32_28 = arith.constant 0 : i32
    %55 = vector.broadcast %c0_i32_28 : i32 to vector<16x1xi32>
    %56 = arith.cmpi sgt, %54, %55 : vector<16x1xi32>
    %57 = vector.shape_cast %56 : vector<16x1xi1> to vector<16x1xi1>
    %58 = vector.broadcast %57 : vector<16x1xi1> to vector<16x31xi1>
    %59 = arith.select %58, %52, %49 : vector<16x31xi1>, vector<16x31xf32>
    %60 = vector.extract_strided_slice %59 {offsets = [0, 8], sizes = [16, 23], strides = [1, 1]} : vector<16x31xf32> to vector<16x23xf32>
    %cst_29 = arith.constant 0.000000e+00 : f32
    %61 = vector.broadcast %cst_29 : f32 to vector<16x8xf32>
    %62 = tpu.concatenate %60, %61 in 1 : vector<16x23xf32>, vector<16x8xf32> -> vector<16x31xf32>
    %c8_i32 = arith.constant 8 : i32
    %63 = vector.broadcast %c8_i32 : i32 to vector<16x1xi32>
    %64 = arith.andi %24, %63 : vector<16x1xi32>
    %c0_i32_30 = arith.constant 0 : i32
    %65 = vector.broadcast %c0_i32_30 : i32 to vector<16x1xi32>
    %66 = arith.cmpi sgt, %64, %65 : vector<16x1xi32>
    %67 = vector.shape_cast %66 : vector<16x1xi1> to vector<16x1xi1>
    %68 = vector.broadcast %67 : vector<16x1xi1> to vector<16x31xi1>
    %69 = arith.select %68, %62, %59 : vector<16x31xi1>, vector<16x31xf32>
    %70 = vector.extract_strided_slice %69 {offsets = [0, 0], sizes = [16, 16], strides = [1, 1]} : vector<16x31xf32> to vector<16x16xf32>
    %71 = arith.addf %28, %70 : vector<16x16xf32>
    %cst_31 = arith.constant 0.353553385 : f32
    %72 = vector.broadcast %cst_31 : f32 to vector<16x16xf32>
    %73 = arith.mulf %71, %72 : vector<16x16xf32>
    %cst_32 = arith.constant 0.000000e+00 : f32
    %74 = vector.broadcast %cst_32 : f32 to vector<16x16xf32>
    %75 = arith.cmpf oeq, %21, %74 : vector<16x16xf32>
    %cst_33 = arith.constant -1.000000e+04 : f32
    %76 = vector.broadcast %cst_33 : f32 to vector<16x16xf32>
    %77 = arith.select %75, %76, %73 : vector<16x16xi1>, vector<16x16xf32>
    %cst_34 = arith.constant dense<0xFF800000> : vector<16xf32>
    %78 = vector.multi_reduction <maximumf>, %77, %cst_34 [1] : vector<16x16xf32> to vector<16xf32>
    %79 = vector.shape_cast %78 : vector<16xf32> to vector<16x1xf32>
    %80 = vector.broadcast %79 : vector<16x1xf32> to vector<16x16xf32>
    %81 = arith.subf %77, %80 : vector<16x16xf32>
    %82 = math.exp %81 : vector<16x16xf32>
    %cst_35 = arith.constant dense<0.000000e+00> : vector<16xf32>
    %83 = vector.multi_reduction <add>, %82, %cst_35 [1] : vector<16x16xf32> to vector<16xf32>
    %84 = vector.shape_cast %83 : vector<16xf32> to vector<16x1xf32>
    %85 = tpu.reciprocal %84 : vector<16x1xf32> -> vector<16x1xf32>
    %86 = vector.broadcast %85 : vector<16x1xf32> to vector<16x16xf32>
    %87 = arith.mulf %82, %86 : vector<16x16xf32>
    %cst_36 = arith.constant dense<0.000000e+00> : vector<16x8xf32>
    %88 = tpu.matmul %87, %27, %cst_36 {dimension_numbers = #tpu.dot_dimension_numbers<[1], [0], [0], [1], [0, 0, 1, 1], [], []>} : vector<16x16xf32>, vector<16x8xf32>, vector<16x8xf32> -> vector<16x8xf32>
    %cst_37 = arith.constant 0.000000e+00 : f32
    %89 = vector.broadcast %cst_37 : f32 to vector<16x15xf32>
    %90 = tpu.concatenate %87, %89 in 1 : vector<16x16xf32>, vector<16x15xf32> -> vector<16x31xf32>
    %cst_38 = arith.constant 0.000000e+00 : f32
    %91 = vector.broadcast %cst_38 : f32 to vector<16x1xf32>
    %92 = vector.extract_strided_slice %90 {offsets = [0, 0], sizes = [16, 30], strides = [1, 1]} : vector<16x31xf32> to vector<16x30xf32>
    %93 = tpu.concatenate %91, %92 in 1 : vector<16x1xf32>, vector<16x30xf32> -> vector<16x31xf32>
    %c1_i32_39 = arith.constant 1 : i32
    %94 = vector.broadcast %c1_i32_39 : i32 to vector<16x1xi32>
    %95 = arith.andi %24, %94 : vector<16x1xi32>
    %c0_i32_40 = arith.constant 0 : i32
    %96 = vector.broadcast %c0_i32_40 : i32 to vector<16x1xi32>
    %97 = arith.cmpi sgt, %95, %96 : vector<16x1xi32>
    %98 = vector.shape_cast %97 : vector<16x1xi1> to vector<16x1xi1>
    %99 = vector.broadcast %98 : vector<16x1xi1> to vector<16x31xi1>
    %100 = arith.select %99, %93, %90 : vector<16x31xi1>, vector<16x31xf32>
    %cst_41 = arith.constant 0.000000e+00 : f32
    %101 = vector.broadcast %cst_41 : f32 to vector<16x2xf32>
    %102 = vector.extract_strided_slice %100 {offsets = [0, 0], sizes = [16, 29], strides = [1, 1]} : vector<16x31xf32> to vector<16x29xf32>
    %103 = tpu.concatenate %101, %102 in 1 : vector<16x2xf32>, vector<16x29xf32> -> vector<16x31xf32>
    %c2_i32_42 = arith.constant 2 : i32
    %104 = vector.broadcast %c2_i32_42 : i32 to vector<16x1xi32>
    %105 = arith.andi %24, %104 : vector<16x1xi32>
    %c0_i32_43 = arith.constant 0 : i32
    %106 = vector.broadcast %c0_i32_43 : i32 to vector<16x1xi32>
    %107 = arith.cmpi sgt, %105, %106 : vector<16x1xi32>
    %108 = vector.shape_cast %107 : vector<16x1xi1> to vector<16x1xi1>
    %109 = vector.broadcast %108 : vector<16x1xi1> to vector<16x31xi1>
    %110 = arith.select %109, %103, %100 : vector<16x31xi1>, vector<16x31xf32>
    %cst_44 = arith.constant 0.000000e+00 : f32
    %111 = vector.broadcast %cst_44 : f32 to vector<16x4xf32>
    %112 = vector.extract_strided_slice %110 {offsets = [0, 0], sizes = [16, 27], strides = [1, 1]} : vector<16x31xf32> to vector<16x27xf32>
    %113 = tpu.concatenate %111, %112 in 1 : vector<16x4xf32>, vector<16x27xf32> -> vector<16x31xf32>
    %c4_i32_45 = arith.constant 4 : i32
    %114 = vector.broadcast %c4_i32_45 : i32 to vector<16x1xi32>
    %115 = arith.andi %24, %114 : vector<16x1xi32>
    %c0_i32_46 = arith.constant 0 : i32
    %116 = vector.broadcast %c0_i32_46 : i32 to vector<16x1xi32>
    %117 = arith.cmpi sgt, %115, %116 : vector<16x1xi32>
    %118 = vector.shape_cast %117 : vector<16x1xi1> to vector<16x1xi1>
    %119 = vector.broadcast %118 : vector<16x1xi1> to vector<16x31xi1>
    %120 = arith.select %119, %113, %110 : vector<16x31xi1>, vector<16x31xf32>
    %cst_47 = arith.constant 0.000000e+00 : f32
    %121 = vector.broadcast %cst_47 : f32 to vector<16x8xf32>
    %122 = vector.extract_strided_slice %120 {offsets = [0, 0], sizes = [16, 23], strides = [1, 1]} : vector<16x31xf32> to vector<16x23xf32>
    %123 = tpu.concatenate %121, %122 in 1 : vector<16x8xf32>, vector<16x23xf32> -> vector<16x31xf32>
    %c8_i32_48 = arith.constant 8 : i32
    %124 = vector.broadcast %c8_i32_48 : i32 to vector<16x1xi32>
    %125 = arith.andi %24, %124 : vector<16x1xi32>
    %c0_i32_49 = arith.constant 0 : i32
    %126 = vector.broadcast %c0_i32_49 : i32 to vector<16x1xi32>
    %127 = arith.cmpi sgt, %125, %126 : vector<16x1xi32>
    %128 = vector.shape_cast %127 : vector<16x1xi1> to vector<16x1xi1>
    %129 = vector.broadcast %128 : vector<16x1xi1> to vector<16x31xi1>
    %130 = arith.select %129, %123, %120 : vector<16x31xi1>, vector<16x31xf32>
    %cst_50 = arith.constant dense<0.000000e+00> : vector<16x8xf32>
    %131 = tpu.matmul %130, %19, %cst_50 {dimension_numbers = #tpu.dot_dimension_numbers<[1], [0], [0], [1], [0, 0, 1, 1], [], []>} : vector<16x31xf32>, vector<31x8xf32>, vector<16x8xf32> -> vector<16x8xf32>
    %132 = arith.addf %88, %131 : vector<16x8xf32>
    %133 = vector.extract_strided_slice %9 {offsets = [0, 8], sizes = [16, 8], strides = [1, 1]} : vector<16x32xf32> to vector<16x8xf32>
    %134 = vector.extract_strided_slice %16 {offsets = [0, 8], sizes = [16, 8], strides = [1, 1]} : vector<16x32xf32> to vector<16x8xf32>
    %135 = vector.extract_strided_slice %17 {offsets = [0, 8], sizes = [16, 8], strides = [1, 1]} : vector<16x32xf32> to vector<16x8xf32>
    %cst_51 = arith.constant dense<0.000000e+00> : vector<16x16xf32>
    %136 = tpu.matmul %133, %134, %cst_51 {dimension_numbers = #tpu.dot_dimension_numbers<[1], [1], [0], [0], [0, 0, 1, 0], [], []>} : vector<16x8xf32>, vector<16x8xf32>, vector<16x16xf32> -> vector<16x16xf32>
    %cst_52 = arith.constant dense<0.000000e+00> : vector<16x31xf32>
    %137 = tpu.matmul %133, %18, %cst_52 {dimension_numbers = #tpu.dot_dimension_numbers<[1], [1], [0], [0], [0, 0, 1, 0], [], []>} : vector<16x8xf32>, vector<31x8xf32>, vector<16x31xf32> -> vector<16x31xf32>
    %138 = vector.extract_strided_slice %137 {offsets = [0, 1], sizes = [16, 30], strides = [1, 1]} : vector<16x31xf32> to vector<16x30xf32>
    %cst_53 = arith.constant 0.000000e+00 : f32
    %139 = vector.broadcast %cst_53 : f32 to vector<16x1xf32>
    %140 = tpu.concatenate %138, %139 in 1 : vector<16x30xf32>, vector<16x1xf32> -> vector<16x31xf32>
    %c1_i32_54 = arith.constant 1 : i32
    %141 = vector.broadcast %c1_i32_54 : i32 to vector<16x1xi32>
    %142 = arith.andi %24, %141 : vector<16x1xi32>
    %c0_i32_55 = arith.constant 0 : i32
    %143 = vector.broadcast %c0_i32_55 : i32 to vector<16x1xi32>
    %144 = arith.cmpi sgt, %142, %143 : vector<16x1xi32>
    %145 = vector.shape_cast %144 : vector<16x1xi1> to vector<16x1xi1>
    %146 = vector.broadcast %145 : vector<16x1xi1> to vector<16x31xi1>
    %147 = arith.select %146, %140, %137 : vector<16x31xi1>, vector<16x31xf32>
    %148 = vector.extract_strided_slice %147 {offsets = [0, 2], sizes = [16, 29], strides = [1, 1]} : vector<16x31xf32> to vector<16x29xf32>
    %cst_56 = arith.constant 0.000000e+00 : f32
    %149 = vector.broadcast %cst_56 : f32 to vector<16x2xf32>
    %150 = tpu.concatenate %148, %149 in 1 : vector<16x29xf32>, vector<16x2xf32> -> vector<16x31xf32>
    %c2_i32_57 = arith.constant 2 : i32
    %151 = vector.broadcast %c2_i32_57 : i32 to vector<16x1xi32>
    %152 = arith.andi %24, %151 : vector<16x1xi32>
    %c0_i32_58 = arith.constant 0 : i32
    %153 = vector.broadcast %c0_i32_58 : i32 to vector<16x1xi32>
    %154 = arith.cmpi sgt, %152, %153 : vector<16x1xi32>
    %155 = vector.shape_cast %154 : vector<16x1xi1> to vector<16x1xi1>
    %156 = vector.broadcast %155 : vector<16x1xi1> to vector<16x31xi1>
    %157 = arith.select %156, %150, %147 : vector<16x31xi1>, vector<16x31xf32>
    %158 = vector.extract_strided_slice %157 {offsets = [0, 4], sizes = [16, 27], strides = [1, 1]} : vector<16x31xf32> to vector<16x27xf32>
    %cst_59 = arith.constant 0.000000e+00 : f32
    %159 = vector.broadcast %cst_59 : f32 to vector<16x4xf32>
    %160 = tpu.concatenate %158, %159 in 1 : vector<16x27xf32>, vector<16x4xf32> -> vector<16x31xf32>
    %c4_i32_60 = arith.constant 4 : i32
    %161 = vector.broadcast %c4_i32_60 : i32 to vector<16x1xi32>
    %162 = arith.andi %24, %161 : vector<16x1xi32>
    %c0_i32_61 = arith.constant 0 : i32
    %163 = vector.broadcast %c0_i32_61 : i32 to vector<16x1xi32>
    %164 = arith.cmpi sgt, %162, %163 : vector<16x1xi32>
    %165 = vector.shape_cast %164 : vector<16x1xi1> to vector<16x1xi1>
    %166 = vector.broadcast %165 : vector<16x1xi1> to vector<16x31xi1>
    %167 = arith.select %166, %160, %157 : vector<16x31xi1>, vector<16x31xf32>
    %168 = vector.extract_strided_slice %167 {offsets = [0, 8], sizes = [16, 23], strides = [1, 1]} : vector<16x31xf32> to vector<16x23xf32>
    %cst_62 = arith.constant 0.000000e+00 : f32
    %169 = vector.broadcast %cst_62 : f32 to vector<16x8xf32>
    %170 = tpu.concatenate %168, %169 in 1 : vector<16x23xf32>, vector<16x8xf32> -> vector<16x31xf32>
    %c8_i32_63 = arith.constant 8 : i32
    %171 = vector.broadcast %c8_i32_63 : i32 to vector<16x1xi32>
    %172 = arith.andi %24, %171 : vector<16x1xi32>
    %c0_i32_64 = arith.constant 0 : i32
    %173 = vector.broadcast %c0_i32_64 : i32 to vector<16x1xi32>
    %174 = arith.cmpi sgt, %172, %173 : vector<16x1xi32>
    %175 = vector.shape_cast %174 : vector<16x1xi1> to vector<16x1xi1>
    %176 = vector.broadcast %175 : vector<16x1xi1> to vector<16x31xi1>
    %177 = arith.select %176, %170, %167 : vector<16x31xi1>, vector<16x31xf32>
    %178 = vector.extract_strided_slice %177 {offsets = [0, 0], sizes = [16, 16], strides = [1, 1]} : vector<16x31xf32> to vector<16x16xf32>
    %179 = arith.addf %136, %178 : vector<16x16xf32>
    %cst_65 = arith.constant 0.353553385 : f32
    %180 = vector.broadcast %cst_65 : f32 to vector<16x16xf32>
    %181 = arith.mulf %179, %180 : vector<16x16xf32>
    %cst_66 = arith.constant 0.000000e+00 : f32
    %182 = vector.broadcast %cst_66 : f32 to vector<16x16xf32>
    %183 = arith.cmpf oeq, %21, %182 : vector<16x16xf32>
    %cst_67 = arith.constant -1.000000e+04 : f32
    %184 = vector.broadcast %cst_67 : f32 to vector<16x16xf32>
    %185 = arith.select %183, %184, %181 : vector<16x16xi1>, vector<16x16xf32>
    %cst_68 = arith.constant dense<0xFF800000> : vector<16xf32>
    %186 = vector.multi_reduction <maximumf>, %185, %cst_68 [1] : vector<16x16xf32> to vector<16xf32>
    %187 = vector.shape_cast %186 : vector<16xf32> to vector<16x1xf32>
    %188 = vector.broadcast %187 : vector<16x1xf32> to vector<16x16xf32>
    %189 = arith.subf %185, %188 : vector<16x16xf32>
    %190 = math.exp %189 : vector<16x16xf32>
    %cst_69 = arith.constant dense<0.000000e+00> : vector<16xf32>
    %191 = vector.multi_reduction <add>, %190, %cst_69 [1] : vector<16x16xf32> to vector<16xf32>
    %192 = vector.shape_cast %191 : vector<16xf32> to vector<16x1xf32>
    %193 = tpu.reciprocal %192 : vector<16x1xf32> -> vector<16x1xf32>
    %194 = vector.broadcast %193 : vector<16x1xf32> to vector<16x16xf32>
    %195 = arith.mulf %190, %194 : vector<16x16xf32>
    %cst_70 = arith.constant dense<0.000000e+00> : vector<16x8xf32>
    %196 = tpu.matmul %195, %135, %cst_70 {dimension_numbers = #tpu.dot_dimension_numbers<[1], [0], [0], [1], [0, 0, 1, 1], [], []>} : vector<16x16xf32>, vector<16x8xf32>, vector<16x8xf32> -> vector<16x8xf32>
    %cst_71 = arith.constant 0.000000e+00 : f32
    %197 = vector.broadcast %cst_71 : f32 to vector<16x15xf32>
    %198 = tpu.concatenate %195, %197 in 1 : vector<16x16xf32>, vector<16x15xf32> -> vector<16x31xf32>
    %cst_72 = arith.constant 0.000000e+00 : f32
    %199 = vector.broadcast %cst_72 : f32 to vector<16x1xf32>
    %200 = vector.extract_strided_slice %198 {offsets = [0, 0], sizes = [16, 30], strides = [1, 1]} : vector<16x31xf32> to vector<16x30xf32>
    %201 = tpu.concatenate %199, %200 in 1 : vector<16x1xf32>, vector<16x30xf32> -> vector<16x31xf32>
    %c1_i32_73 = arith.constant 1 : i32
    %202 = vector.broadcast %c1_i32_73 : i32 to vector<16x1xi32>
    %203 = arith.andi %24, %202 : vector<16x1xi32>
    %c0_i32_74 = arith.constant 0 : i32
    %204 = vector.broadcast %c0_i32_74 : i32 to vector<16x1xi32>
    %205 = arith.cmpi sgt, %203, %204 : vector<16x1xi32>
    %206 = vector.shape_cast %205 : vector<16x1xi1> to vector<16x1xi1>
    %207 = vector.broadcast %206 : vector<16x1xi1> to vector<16x31xi1>
    %208 = arith.select %207, %201, %198 : vector<16x31xi1>, vector<16x31xf32>
    %cst_75 = arith.constant 0.000000e+00 : f32
    %209 = vector.broadcast %cst_75 : f32 to vector<16x2xf32>
    %210 = vector.extract_strided_slice %208 {offsets = [0, 0], sizes = [16, 29], strides = [1, 1]} : vector<16x31xf32> to vector<16x29xf32>
    %211 = tpu.concatenate %209, %210 in 1 : vector<16x2xf32>, vector<16x29xf32> -> vector<16x31xf32>
    %c2_i32_76 = arith.constant 2 : i32
    %212 = vector.broadcast %c2_i32_76 : i32 to vector<16x1xi32>
    %213 = arith.andi %24, %212 : vector<16x1xi32>
    %c0_i32_77 = arith.constant 0 : i32
    %214 = vector.broadcast %c0_i32_77 : i32 to vector<16x1xi32>
    %215 = arith.cmpi sgt, %213, %214 : vector<16x1xi32>
    %216 = vector.shape_cast %215 : vector<16x1xi1> to vector<16x1xi1>
    %217 = vector.broadcast %216 : vector<16x1xi1> to vector<16x31xi1>
    %218 = arith.select %217, %211, %208 : vector<16x31xi1>, vector<16x31xf32>
    %cst_78 = arith.constant 0.000000e+00 : f32
    %219 = vector.broadcast %cst_78 : f32 to vector<16x4xf32>
    %220 = vector.extract_strided_slice %218 {offsets = [0, 0], sizes = [16, 27], strides = [1, 1]} : vector<16x31xf32> to vector<16x27xf32>
    %221 = tpu.concatenate %219, %220 in 1 : vector<16x4xf32>, vector<16x27xf32> -> vector<16x31xf32>
    %c4_i32_79 = arith.constant 4 : i32
    %222 = vector.broadcast %c4_i32_79 : i32 to vector<16x1xi32>
    %223 = arith.andi %24, %222 : vector<16x1xi32>
    %c0_i32_80 = arith.constant 0 : i32
    %224 = vector.broadcast %c0_i32_80 : i32 to vector<16x1xi32>
    %225 = arith.cmpi sgt, %223, %224 : vector<16x1xi32>
    %226 = vector.shape_cast %225 : vector<16x1xi1> to vector<16x1xi1>
    %227 = vector.broadcast %226 : vector<16x1xi1> to vector<16x31xi1>
    %228 = arith.select %227, %221, %218 : vector<16x31xi1>, vector<16x31xf32>
    %cst_81 = arith.constant 0.000000e+00 : f32
    %229 = vector.broadcast %cst_81 : f32 to vector<16x8xf32>
    %230 = vector.extract_strided_slice %228 {offsets = [0, 0], sizes = [16, 23], strides = [1, 1]} : vector<16x31xf32> to vector<16x23xf32>
    %231 = tpu.concatenate %229, %230 in 1 : vector<16x8xf32>, vector<16x23xf32> -> vector<16x31xf32>
    %c8_i32_82 = arith.constant 8 : i32
    %232 = vector.broadcast %c8_i32_82 : i32 to vector<16x1xi32>
    %233 = arith.andi %24, %232 : vector<16x1xi32>
    %c0_i32_83 = arith.constant 0 : i32
    %234 = vector.broadcast %c0_i32_83 : i32 to vector<16x1xi32>
    %235 = arith.cmpi sgt, %233, %234 : vector<16x1xi32>
    %236 = vector.shape_cast %235 : vector<16x1xi1> to vector<16x1xi1>
    %237 = vector.broadcast %236 : vector<16x1xi1> to vector<16x31xi1>
    %238 = arith.select %237, %231, %228 : vector<16x31xi1>, vector<16x31xf32>
    %cst_84 = arith.constant dense<0.000000e+00> : vector<16x8xf32>
    %239 = tpu.matmul %238, %19, %cst_84 {dimension_numbers = #tpu.dot_dimension_numbers<[1], [0], [0], [1], [0, 0, 1, 1], [], []>} : vector<16x31xf32>, vector<31x8xf32>, vector<16x8xf32> -> vector<16x8xf32>
    %240 = arith.addf %196, %239 : vector<16x8xf32>
    %241 = vector.extract_strided_slice %9 {offsets = [0, 16], sizes = [16, 8], strides = [1, 1]} : vector<16x32xf32> to vector<16x8xf32>
    %242 = vector.extract_strided_slice %16 {offsets = [0, 16], sizes = [16, 8], strides = [1, 1]} : vector<16x32xf32> to vector<16x8xf32>
    %243 = vector.extract_strided_slice %17 {offsets = [0, 16], sizes = [16, 8], strides = [1, 1]} : vector<16x32xf32> to vector<16x8xf32>
    %cst_85 = arith.constant dense<0.000000e+00> : vector<16x16xf32>
    %244 = tpu.matmul %241, %242, %cst_85 {dimension_numbers = #tpu.dot_dimension_numbers<[1], [1], [0], [0], [0, 0, 1, 0], [], []>} : vector<16x8xf32>, vector<16x8xf32>, vector<16x16xf32> -> vector<16x16xf32>
    %cst_86 = arith.constant dense<0.000000e+00> : vector<16x31xf32>
    %245 = tpu.matmul %241, %18, %cst_86 {dimension_numbers = #tpu.dot_dimension_numbers<[1], [1], [0], [0], [0, 0, 1, 0], [], []>} : vector<16x8xf32>, vector<31x8xf32>, vector<16x31xf32> -> vector<16x31xf32>
    %246 = vector.extract_strided_slice %245 {offsets = [0, 1], sizes = [16, 30], strides = [1, 1]} : vector<16x31xf32> to vector<16x30xf32>
    %cst_87 = arith.constant 0.000000e+00 : f32
    %247 = vector.broadcast %cst_87 : f32 to vector<16x1xf32>
    %248 = tpu.concatenate %246, %247 in 1 : vector<16x30xf32>, vector<16x1xf32> -> vector<16x31xf32>
    %c1_i32_88 = arith.constant 1 : i32
    %249 = vector.broadcast %c1_i32_88 : i32 to vector<16x1xi32>
    %250 = arith.andi %24, %249 : vector<16x1xi32>
    %c0_i32_89 = arith.constant 0 : i32
    %251 = vector.broadcast %c0_i32_89 : i32 to vector<16x1xi32>
    %252 = arith.cmpi sgt, %250, %251 : vector<16x1xi32>
    %253 = vector.shape_cast %252 : vector<16x1xi1> to vector<16x1xi1>
    %254 = vector.broadcast %253 : vector<16x1xi1> to vector<16x31xi1>
    %255 = arith.select %254, %248, %245 : vector<16x31xi1>, vector<16x31xf32>
    %256 = vector.extract_strided_slice %255 {offsets = [0, 2], sizes = [16, 29], strides = [1, 1]} : vector<16x31xf32> to vector<16x29xf32>
    %cst_90 = arith.constant 0.000000e+00 : f32
    %257 = vector.broadcast %cst_90 : f32 to vector<16x2xf32>
    %258 = tpu.concatenate %256, %257 in 1 : vector<16x29xf32>, vector<16x2xf32> -> vector<16x31xf32>
    %c2_i32_91 = arith.constant 2 : i32
    %259 = vector.broadcast %c2_i32_91 : i32 to vector<16x1xi32>
    %260 = arith.andi %24, %259 : vector<16x1xi32>
    %c0_i32_92 = arith.constant 0 : i32
    %261 = vector.broadcast %c0_i32_92 : i32 to vector<16x1xi32>
    %262 = arith.cmpi sgt, %260, %261 : vector<16x1xi32>
    %263 = vector.shape_cast %262 : vector<16x1xi1> to vector<16x1xi1>
    %264 = vector.broadcast %263 : vector<16x1xi1> to vector<16x31xi1>
    %265 = arith.select %264, %258, %255 : vector<16x31xi1>, vector<16x31xf32>
    %266 = vector.extract_strided_slice %265 {offsets = [0, 4], sizes = [16, 27], strides = [1, 1]} : vector<16x31xf32> to vector<16x27xf32>
    %cst_93 = arith.constant 0.000000e+00 : f32
    %267 = vector.broadcast %cst_93 : f32 to vector<16x4xf32>
    %268 = tpu.concatenate %266, %267 in 1 : vector<16x27xf32>, vector<16x4xf32> -> vector<16x31xf32>
    %c4_i32_94 = arith.constant 4 : i32
    %269 = vector.broadcast %c4_i32_94 : i32 to vector<16x1xi32>
    %270 = arith.andi %24, %269 : vector<16x1xi32>
    %c0_i32_95 = arith.constant 0 : i32
    %271 = vector.broadcast %c0_i32_95 : i32 to vector<16x1xi32>
    %272 = arith.cmpi sgt, %270, %271 : vector<16x1xi32>
    %273 = vector.shape_cast %272 : vector<16x1xi1> to vector<16x1xi1>
    %274 = vector.broadcast %273 : vector<16x1xi1> to vector<16x31xi1>
    %275 = arith.select %274, %268, %265 : vector<16x31xi1>, vector<16x31xf32>
    %276 = vector.extract_strided_slice %275 {offsets = [0, 8], sizes = [16, 23], strides = [1, 1]} : vector<16x31xf32> to vector<16x23xf32>
    %cst_96 = arith.constant 0.000000e+00 : f32
    %277 = vector.broadcast %cst_96 : f32 to vector<16x8xf32>
    %278 = tpu.concatenate %276, %277 in 1 : vector<16x23xf32>, vector<16x8xf32> -> vector<16x31xf32>
    %c8_i32_97 = arith.constant 8 : i32
    %279 = vector.broadcast %c8_i32_97 : i32 to vector<16x1xi32>
    %280 = arith.andi %24, %279 : vector<16x1xi32>
    %c0_i32_98 = arith.constant 0 : i32
    %281 = vector.broadcast %c0_i32_98 : i32 to vector<16x1xi32>
    %282 = arith.cmpi sgt, %280, %281 : vector<16x1xi32>
    %283 = vector.shape_cast %282 : vector<16x1xi1> to vector<16x1xi1>
    %284 = vector.broadcast %283 : vector<16x1xi1> to vector<16x31xi1>
    %285 = arith.select %284, %278, %275 : vector<16x31xi1>, vector<16x31xf32>
    %286 = vector.extract_strided_slice %285 {offsets = [0, 0], sizes = [16, 16], strides = [1, 1]} : vector<16x31xf32> to vector<16x16xf32>
    %287 = arith.addf %244, %286 : vector<16x16xf32>
    %cst_99 = arith.constant 0.353553385 : f32
    %288 = vector.broadcast %cst_99 : f32 to vector<16x16xf32>
    %289 = arith.mulf %287, %288 : vector<16x16xf32>
    %cst_100 = arith.constant 0.000000e+00 : f32
    %290 = vector.broadcast %cst_100 : f32 to vector<16x16xf32>
    %291 = arith.cmpf oeq, %21, %290 : vector<16x16xf32>
    %cst_101 = arith.constant -1.000000e+04 : f32
    %292 = vector.broadcast %cst_101 : f32 to vector<16x16xf32>
    %293 = arith.select %291, %292, %289 : vector<16x16xi1>, vector<16x16xf32>
    %cst_102 = arith.constant dense<0xFF800000> : vector<16xf32>
    %294 = vector.multi_reduction <maximumf>, %293, %cst_102 [1] : vector<16x16xf32> to vector<16xf32>
    %295 = vector.shape_cast %294 : vector<16xf32> to vector<16x1xf32>
    %296 = vector.broadcast %295 : vector<16x1xf32> to vector<16x16xf32>
    %297 = arith.subf %293, %296 : vector<16x16xf32>
    %298 = math.exp %297 : vector<16x16xf32>
    %cst_103 = arith.constant dense<0.000000e+00> : vector<16xf32>
    %299 = vector.multi_reduction <add>, %298, %cst_103 [1] : vector<16x16xf32> to vector<16xf32>
    %300 = vector.shape_cast %299 : vector<16xf32> to vector<16x1xf32>
    %301 = tpu.reciprocal %300 : vector<16x1xf32> -> vector<16x1xf32>
    %302 = vector.broadcast %301 : vector<16x1xf32> to vector<16x16xf32>
    %303 = arith.mulf %298, %302 : vector<16x16xf32>
    %cst_104 = arith.constant dense<0.000000e+00> : vector<16x8xf32>
    %304 = tpu.matmul %303, %243, %cst_104 {dimension_numbers = #tpu.dot_dimension_numbers<[1], [0], [0], [1], [0, 0, 1, 1], [], []>} : vector<16x16xf32>, vector<16x8xf32>, vector<16x8xf32> -> vector<16x8xf32>
    %cst_105 = arith.constant 0.000000e+00 : f32
    %305 = vector.broadcast %cst_105 : f32 to vector<16x15xf32>
    %306 = tpu.concatenate %303, %305 in 1 : vector<16x16xf32>, vector<16x15xf32> -> vector<16x31xf32>
    %cst_106 = arith.constant 0.000000e+00 : f32
    %307 = vector.broadcast %cst_106 : f32 to vector<16x1xf32>
    %308 = vector.extract_strided_slice %306 {offsets = [0, 0], sizes = [16, 30], strides = [1, 1]} : vector<16x31xf32> to vector<16x30xf32>
    %309 = tpu.concatenate %307, %308 in 1 : vector<16x1xf32>, vector<16x30xf32> -> vector<16x31xf32>
    %c1_i32_107 = arith.constant 1 : i32
    %310 = vector.broadcast %c1_i32_107 : i32 to vector<16x1xi32>
    %311 = arith.andi %24, %310 : vector<16x1xi32>
    %c0_i32_108 = arith.constant 0 : i32
    %312 = vector.broadcast %c0_i32_108 : i32 to vector<16x1xi32>
    %313 = arith.cmpi sgt, %311, %312 : vector<16x1xi32>
    %314 = vector.shape_cast %313 : vector<16x1xi1> to vector<16x1xi1>
    %315 = vector.broadcast %314 : vector<16x1xi1> to vector<16x31xi1>
    %316 = arith.select %315, %309, %306 : vector<16x31xi1>, vector<16x31xf32>
    %cst_109 = arith.constant 0.000000e+00 : f32
    %317 = vector.broadcast %cst_109 : f32 to vector<16x2xf32>
    %318 = vector.extract_strided_slice %316 {offsets = [0, 0], sizes = [16, 29], strides = [1, 1]} : vector<16x31xf32> to vector<16x29xf32>
    %319 = tpu.concatenate %317, %318 in 1 : vector<16x2xf32>, vector<16x29xf32> -> vector<16x31xf32>
    %c2_i32_110 = arith.constant 2 : i32
    %320 = vector.broadcast %c2_i32_110 : i32 to vector<16x1xi32>
    %321 = arith.andi %24, %320 : vector<16x1xi32>
    %c0_i32_111 = arith.constant 0 : i32
    %322 = vector.broadcast %c0_i32_111 : i32 to vector<16x1xi32>
    %323 = arith.cmpi sgt, %321, %322 : vector<16x1xi32>
    %324 = vector.shape_cast %323 : vector<16x1xi1> to vector<16x1xi1>
    %325 = vector.broadcast %324 : vector<16x1xi1> to vector<16x31xi1>
    %326 = arith.select %325, %319, %316 : vector<16x31xi1>, vector<16x31xf32>
    %cst_112 = arith.constant 0.000000e+00 : f32
    %327 = vector.broadcast %cst_112 : f32 to vector<16x4xf32>
    %328 = vector.extract_strided_slice %326 {offsets = [0, 0], sizes = [16, 27], strides = [1, 1]} : vector<16x31xf32> to vector<16x27xf32>
    %329 = tpu.concatenate %327, %328 in 1 : vector<16x4xf32>, vector<16x27xf32> -> vector<16x31xf32>
    %c4_i32_113 = arith.constant 4 : i32
    %330 = vector.broadcast %c4_i32_113 : i32 to vector<16x1xi32>
    %331 = arith.andi %24, %330 : vector<16x1xi32>
    %c0_i32_114 = arith.constant 0 : i32
    %332 = vector.broadcast %c0_i32_114 : i32 to vector<16x1xi32>
    %333 = arith.cmpi sgt, %331, %332 : vector<16x1xi32>
    %334 = vector.shape_cast %333 : vector<16x1xi1> to vector<16x1xi1>
    %335 = vector.broadcast %334 : vector<16x1xi1> to vector<16x31xi1>
    %336 = arith.select %335, %329, %326 : vector<16x31xi1>, vector<16x31xf32>
    %cst_115 = arith.constant 0.000000e+00 : f32
    %337 = vector.broadcast %cst_115 : f32 to vector<16x8xf32>
    %338 = vector.extract_strided_slice %336 {offsets = [0, 0], sizes = [16, 23], strides = [1, 1]} : vector<16x31xf32> to vector<16x23xf32>
    %339 = tpu.concatenate %337, %338 in 1 : vector<16x8xf32>, vector<16x23xf32> -> vector<16x31xf32>
    %c8_i32_116 = arith.constant 8 : i32
    %340 = vector.broadcast %c8_i32_116 : i32 to vector<16x1xi32>
    %341 = arith.andi %24, %340 : vector<16x1xi32>
    %c0_i32_117 = arith.constant 0 : i32
    %342 = vector.broadcast %c0_i32_117 : i32 to vector<16x1xi32>
    %343 = arith.cmpi sgt, %341, %342 : vector<16x1xi32>
    %344 = vector.shape_cast %343 : vector<16x1xi1> to vector<16x1xi1>
    %345 = vector.broadcast %344 : vector<16x1xi1> to vector<16x31xi1>
    %346 = arith.select %345, %339, %336 : vector<16x31xi1>, vector<16x31xf32>
    %cst_118 = arith.constant dense<0.000000e+00> : vector<16x8xf32>
    %347 = tpu.matmul %346, %19, %cst_118 {dimension_numbers = #tpu.dot_dimension_numbers<[1], [0], [0], [1], [0, 0, 1, 1], [], []>} : vector<16x31xf32>, vector<31x8xf32>, vector<16x8xf32> -> vector<16x8xf32>
    %348 = arith.addf %304, %347 : vector<16x8xf32>
    %349 = vector.extract_strided_slice %9 {offsets = [0, 24], sizes = [16, 8], strides = [1, 1]} : vector<16x32xf32> to vector<16x8xf32>
    %350 = vector.extract_strided_slice %16 {offsets = [0, 24], sizes = [16, 8], strides = [1, 1]} : vector<16x32xf32> to vector<16x8xf32>
    %351 = vector.extract_strided_slice %17 {offsets = [0, 24], sizes = [16, 8], strides = [1, 1]} : vector<16x32xf32> to vector<16x8xf32>
    %cst_119 = arith.constant dense<0.000000e+00> : vector<16x16xf32>
    %352 = tpu.matmul %349, %350, %cst_119 {dimension_numbers = #tpu.dot_dimension_numbers<[1], [1], [0], [0], [0, 0, 1, 0], [], []>} : vector<16x8xf32>, vector<16x8xf32>, vector<16x16xf32> -> vector<16x16xf32>
    %cst_120 = arith.constant dense<0.000000e+00> : vector<16x31xf32>
    %353 = tpu.matmul %349, %18, %cst_120 {dimension_numbers = #tpu.dot_dimension_numbers<[1], [1], [0], [0], [0, 0, 1, 0], [], []>} : vector<16x8xf32>, vector<31x8xf32>, vector<16x31xf32> -> vector<16x31xf32>
    %354 = vector.extract_strided_slice %353 {offsets = [0, 1], sizes = [16, 30], strides = [1, 1]} : vector<16x31xf32> to vector<16x30xf32>
    %cst_121 = arith.constant 0.000000e+00 : f32
    %355 = vector.broadcast %cst_121 : f32 to vector<16x1xf32>
    %356 = tpu.concatenate %354, %355 in 1 : vector<16x30xf32>, vector<16x1xf32> -> vector<16x31xf32>
    %c1_i32_122 = arith.constant 1 : i32
    %357 = vector.broadcast %c1_i32_122 : i32 to vector<16x1xi32>
    %358 = arith.andi %24, %357 : vector<16x1xi32>
    %c0_i32_123 = arith.constant 0 : i32
    %359 = vector.broadcast %c0_i32_123 : i32 to vector<16x1xi32>
    %360 = arith.cmpi sgt, %358, %359 : vector<16x1xi32>
    %361 = vector.shape_cast %360 : vector<16x1xi1> to vector<16x1xi1>
    %362 = vector.broadcast %361 : vector<16x1xi1> to vector<16x31xi1>
    %363 = arith.select %362, %356, %353 : vector<16x31xi1>, vector<16x31xf32>
    %364 = vector.extract_strided_slice %363 {offsets = [0, 2], sizes = [16, 29], strides = [1, 1]} : vector<16x31xf32> to vector<16x29xf32>
    %cst_124 = arith.constant 0.000000e+00 : f32
    %365 = vector.broadcast %cst_124 : f32 to vector<16x2xf32>
    %366 = tpu.concatenate %364, %365 in 1 : vector<16x29xf32>, vector<16x2xf32> -> vector<16x31xf32>
    %c2_i32_125 = arith.constant 2 : i32
    %367 = vector.broadcast %c2_i32_125 : i32 to vector<16x1xi32>
    %368 = arith.andi %24, %367 : vector<16x1xi32>
    %c0_i32_126 = arith.constant 0 : i32
    %369 = vector.broadcast %c0_i32_126 : i32 to vector<16x1xi32>
    %370 = arith.cmpi sgt, %368, %369 : vector<16x1xi32>
    %371 = vector.shape_cast %370 : vector<16x1xi1> to vector<16x1xi1>
    %372 = vector.broadcast %371 : vector<16x1xi1> to vector<16x31xi1>
    %373 = arith.select %372, %366, %363 : vector<16x31xi1>, vector<16x31xf32>
    %374 = vector.extract_strided_slice %373 {offsets = [0, 4], sizes = [16, 27], strides = [1, 1]} : vector<16x31xf32> to vector<16x27xf32>
    %cst_127 = arith.constant 0.000000e+00 : f32
    %375 = vector.broadcast %cst_127 : f32 to vector<16x4xf32>
    %376 = tpu.concatenate %374, %375 in 1 : vector<16x27xf32>, vector<16x4xf32> -> vector<16x31xf32>
    %c4_i32_128 = arith.constant 4 : i32
    %377 = vector.broadcast %c4_i32_128 : i32 to vector<16x1xi32>
    %378 = arith.andi %24, %377 : vector<16x1xi32>
    %c0_i32_129 = arith.constant 0 : i32
    %379 = vector.broadcast %c0_i32_129 : i32 to vector<16x1xi32>
    %380 = arith.cmpi sgt, %378, %379 : vector<16x1xi32>
    %381 = vector.shape_cast %380 : vector<16x1xi1> to vector<16x1xi1>
    %382 = vector.broadcast %381 : vector<16x1xi1> to vector<16x31xi1>
    %383 = arith.select %382, %376, %373 : vector<16x31xi1>, vector<16x31xf32>
    %384 = vector.extract_strided_slice %383 {offsets = [0, 8], sizes = [16, 23], strides = [1, 1]} : vector<16x31xf32> to vector<16x23xf32>
    %cst_130 = arith.constant 0.000000e+00 : f32
    %385 = vector.broadcast %cst_130 : f32 to vector<16x8xf32>
    %386 = tpu.concatenate %384, %385 in 1 : vector<16x23xf32>, vector<16x8xf32> -> vector<16x31xf32>
    %c8_i32_131 = arith.constant 8 : i32
    %387 = vector.broadcast %c8_i32_131 : i32 to vector<16x1xi32>
    %388 = arith.andi %24, %387 : vector<16x1xi32>
    %c0_i32_132 = arith.constant 0 : i32
    %389 = vector.broadcast %c0_i32_132 : i32 to vector<16x1xi32>
    %390 = arith.cmpi sgt, %388, %389 : vector<16x1xi32>
    %391 = vector.shape_cast %390 : vector<16x1xi1> to vector<16x1xi1>
    %392 = vector.broadcast %391 : vector<16x1xi1> to vector<16x31xi1>
    %393 = arith.select %392, %386, %383 : vector<16x31xi1>, vector<16x31xf32>
    %394 = vector.extract_strided_slice %393 {offsets = [0, 0], sizes = [16, 16], strides = [1, 1]} : vector<16x31xf32> to vector<16x16xf32>
    %395 = arith.addf %352, %394 : vector<16x16xf32>
    %cst_133 = arith.constant 0.353553385 : f32
    %396 = vector.broadcast %cst_133 : f32 to vector<16x16xf32>
    %397 = arith.mulf %395, %396 : vector<16x16xf32>
    %cst_134 = arith.constant 0.000000e+00 : f32
    %398 = vector.broadcast %cst_134 : f32 to vector<16x16xf32>
    %399 = arith.cmpf oeq, %21, %398 : vector<16x16xf32>
    %cst_135 = arith.constant -1.000000e+04 : f32
    %400 = vector.broadcast %cst_135 : f32 to vector<16x16xf32>
    %401 = arith.select %399, %400, %397 : vector<16x16xi1>, vector<16x16xf32>
    %cst_136 = arith.constant dense<0xFF800000> : vector<16xf32>
    %402 = vector.multi_reduction <maximumf>, %401, %cst_136 [1] : vector<16x16xf32> to vector<16xf32>
    %403 = vector.shape_cast %402 : vector<16xf32> to vector<16x1xf32>
    %404 = vector.broadcast %403 : vector<16x1xf32> to vector<16x16xf32>
    %405 = arith.subf %401, %404 : vector<16x16xf32>
    %406 = math.exp %405 : vector<16x16xf32>
    %cst_137 = arith.constant dense<0.000000e+00> : vector<16xf32>
    %407 = vector.multi_reduction <add>, %406, %cst_137 [1] : vector<16x16xf32> to vector<16xf32>
    %408 = vector.shape_cast %407 : vector<16xf32> to vector<16x1xf32>
    %409 = tpu.reciprocal %408 : vector<16x1xf32> -> vector<16x1xf32>
    %410 = vector.broadcast %409 : vector<16x1xf32> to vector<16x16xf32>
    %411 = arith.mulf %406, %410 : vector<16x16xf32>
    %cst_138 = arith.constant dense<0.000000e+00> : vector<16x8xf32>
    %412 = tpu.matmul %411, %351, %cst_138 {dimension_numbers = #tpu.dot_dimension_numbers<[1], [0], [0], [1], [0, 0, 1, 1], [], []>} : vector<16x16xf32>, vector<16x8xf32>, vector<16x8xf32> -> vector<16x8xf32>
    %cst_139 = arith.constant 0.000000e+00 : f32
    %413 = vector.broadcast %cst_139 : f32 to vector<16x15xf32>
    %414 = tpu.concatenate %411, %413 in 1 : vector<16x16xf32>, vector<16x15xf32> -> vector<16x31xf32>
    %cst_140 = arith.constant 0.000000e+00 : f32
    %415 = vector.broadcast %cst_140 : f32 to vector<16x1xf32>
    %416 = vector.extract_strided_slice %414 {offsets = [0, 0], sizes = [16, 30], strides = [1, 1]} : vector<16x31xf32> to vector<16x30xf32>
    %417 = tpu.concatenate %415, %416 in 1 : vector<16x1xf32>, vector<16x30xf32> -> vector<16x31xf32>
    %c1_i32_141 = arith.constant 1 : i32
    %418 = vector.broadcast %c1_i32_141 : i32 to vector<16x1xi32>
    %419 = arith.andi %24, %418 : vector<16x1xi32>
    %c0_i32_142 = arith.constant 0 : i32
    %420 = vector.broadcast %c0_i32_142 : i32 to vector<16x1xi32>
    %421 = arith.cmpi sgt, %419, %420 : vector<16x1xi32>
    %422 = vector.shape_cast %421 : vector<16x1xi1> to vector<16x1xi1>
    %423 = vector.broadcast %422 : vector<16x1xi1> to vector<16x31xi1>
    %424 = arith.select %423, %417, %414 : vector<16x31xi1>, vector<16x31xf32>
    %cst_143 = arith.constant 0.000000e+00 : f32
    %425 = vector.broadcast %cst_143 : f32 to vector<16x2xf32>
    %426 = vector.extract_strided_slice %424 {offsets = [0, 0], sizes = [16, 29], strides = [1, 1]} : vector<16x31xf32> to vector<16x29xf32>
    %427 = tpu.concatenate %425, %426 in 1 : vector<16x2xf32>, vector<16x29xf32> -> vector<16x31xf32>
    %c2_i32_144 = arith.constant 2 : i32
    %428 = vector.broadcast %c2_i32_144 : i32 to vector<16x1xi32>
    %429 = arith.andi %24, %428 : vector<16x1xi32>
    %c0_i32_145 = arith.constant 0 : i32
    %430 = vector.broadcast %c0_i32_145 : i32 to vector<16x1xi32>
    %431 = arith.cmpi sgt, %429, %430 : vector<16x1xi32>
    %432 = vector.shape_cast %431 : vector<16x1xi1> to vector<16x1xi1>
    %433 = vector.broadcast %432 : vector<16x1xi1> to vector<16x31xi1>
    %434 = arith.select %433, %427, %424 : vector<16x31xi1>, vector<16x31xf32>
    %cst_146 = arith.constant 0.000000e+00 : f32
    %435 = vector.broadcast %cst_146 : f32 to vector<16x4xf32>
    %436 = vector.extract_strided_slice %434 {offsets = [0, 0], sizes = [16, 27], strides = [1, 1]} : vector<16x31xf32> to vector<16x27xf32>
    %437 = tpu.concatenate %435, %436 in 1 : vector<16x4xf32>, vector<16x27xf32> -> vector<16x31xf32>
    %c4_i32_147 = arith.constant 4 : i32
    %438 = vector.broadcast %c4_i32_147 : i32 to vector<16x1xi32>
    %439 = arith.andi %24, %438 : vector<16x1xi32>
    %c0_i32_148 = arith.constant 0 : i32
    %440 = vector.broadcast %c0_i32_148 : i32 to vector<16x1xi32>
    %441 = arith.cmpi sgt, %439, %440 : vector<16x1xi32>
    %442 = vector.shape_cast %441 : vector<16x1xi1> to vector<16x1xi1>
    %443 = vector.broadcast %442 : vector<16x1xi1> to vector<16x31xi1>
    %444 = arith.select %443, %437, %434 : vector<16x31xi1>, vector<16x31xf32>
    %cst_149 = arith.constant 0.000000e+00 : f32
    %445 = vector.broadcast %cst_149 : f32 to vector<16x8xf32>
    %446 = vector.extract_strided_slice %444 {offsets = [0, 0], sizes = [16, 23], strides = [1, 1]} : vector<16x31xf32> to vector<16x23xf32>
    %447 = tpu.concatenate %445, %446 in 1 : vector<16x8xf32>, vector<16x23xf32> -> vector<16x31xf32>
    %c8_i32_150 = arith.constant 8 : i32
    %448 = vector.broadcast %c8_i32_150 : i32 to vector<16x1xi32>
    %449 = arith.andi %24, %448 : vector<16x1xi32>
    %c0_i32_151 = arith.constant 0 : i32
    %450 = vector.broadcast %c0_i32_151 : i32 to vector<16x1xi32>
    %451 = arith.cmpi sgt, %449, %450 : vector<16x1xi32>
    %452 = vector.shape_cast %451 : vector<16x1xi1> to vector<16x1xi1>
    %453 = vector.broadcast %452 : vector<16x1xi1> to vector<16x31xi1>
    %454 = arith.select %453, %447, %444 : vector<16x31xi1>, vector<16x31xf32>
    %cst_152 = arith.constant dense<0.000000e+00> : vector<16x8xf32>
    %455 = tpu.matmul %454, %19, %cst_152 {dimension_numbers = #tpu.dot_dimension_numbers<[1], [0], [0], [1], [0, 0, 1, 1], [], []>} : vector<16x31xf32>, vector<31x8xf32>, vector<16x8xf32> -> vector<16x8xf32>
    %456 = arith.addf %412, %455 : vector<16x8xf32>
    %457 = tpu.concatenate %132, %240, %348, %456 in 1 : vector<16x8xf32>, vector<16x8xf32>, vector<16x8xf32>, vector<16x8xf32> -> vector<16x32xf32>
    %c0_153 = arith.constant 0 : index
    %c0_154 = arith.constant 0 : index
    %458 = vector.load %arg7[%c0_153, %c0_154] : memref<32x32xf32, #tpu.memory_space<vmem>>, vector<32x32xf32>
    %cst_155 = arith.constant dense<0.000000e+00> : vector<32x16xf32>
    %459 = tpu.matmul %458, %457, %cst_155 {dimension_numbers = #tpu.dot_dimension_numbers<[1], [1], [0], [0], [0, 0, 1, 0], [], []>} : vector<32x32xf32>, vector<16x32xf32>, vector<32x16xf32> -> vector<32x16xf32>
    %c0_156 = arith.constant 0 : index
    %c0_157 = arith.constant 0 : index
    %460 = vector.load %arg8[%c0_156, %c0_157] : memref<32x1xf32, #tpu.memory_space<vmem>>, vector<32x1xf32>
    %461 = vector.broadcast %460 : vector<32x1xf32> to vector<32x16xf32>
    %462 = arith.addf %459, %461 : vector<32x16xf32>
    %c0_158 = arith.constant 0 : index
    %c0_159 = arith.constant 0 : index
    %c0_160 = arith.constant 0 : index
    %463 = vector.load %arg12[%c0_158, %c0_159, %c0_160] : memref<1x32x16xf32, #tpu.memory_space<vmem>>, vector<1x32x16xf32>
    %464 = vector.shape_cast %463 : vector<1x32x16xf32> to vector<32x16xf32>
    %465 = vector.shape_cast %462 : vector<32x16xf32> to vector<1x32x16xf32>
    tpu.vector_store %arg12[%c0_158, %c0_159, %c0_160], %465 {strides = array<i32>} : memref<1x32x16xf32, #tpu.memory_space<vmem>>, vector<1x32x16xf32>,
    return
  }
  func.func @transform_0(%arg0: i32) -> (i32, i32, i32) {
    %c0_i32 = arith.constant 0 : i32
    %c0_i32_0 = arith.constant 0 : i32
    %c0_i32_1 = arith.constant 0 : i32
    return %arg0, %c0_i32, %c0_i32_0 : i32, i32, i32
  }
  func.func @transform_1(%arg0: i32) -> (i32, i32, i32) {
    %c0_i32 = arith.constant 0 : i32
    %c0_i32_0 = arith.constant 0 : i32
    %c0_i32_1 = arith.constant 0 : i32
    return %arg0, %c0_i32, %c0_i32_0 : i32, i32, i32
  }
  func.func @transform_2(%arg0: i32) -> (i32, i32) {
    %c0_i32 = arith.constant 0 : i32
    %c0_i32_0 = arith.constant 0 : i32
    %c0_i32_1 = arith.constant 0 : i32
    return %c0_i32, %c0_i32_0 : i32, i32
  }
  func.func @transform_3(%arg0: i32) -> (i32, i32) {
    %c0_i32 = arith.constant 0 : i32
    %c0_i32_0 = arith.constant 0 : i32
    %c0_i32_1 = arith.constant 0 : i32
    return %c0_i32, %c0_i32_0 : i32, i32
  }
  func.func @transform_4(%arg0: i32) -> (i32, i32) {
    %c0_i32 = arith.constant 0 : i32
    %c0_i32_0 = arith.constant 0 : i32
    %c0_i32_1 = arith.constant 0 : i32
    return %c0_i32, %c0_i32_0 : i32, i32
  }
  func.func @transform_5(%arg0: i32) -> (i32, i32) {
    %c0_i32 = arith.constant 0 : i32
    %c0_i32_0 = arith.constant 0 : i32
    %c0_i32_1 = arith.constant 0 : i32
    return %c0_i32, %c0_i32_0 : i32, i32
  }
  func.func @transform_6(%arg0: i32) -> (i32, i32) {
    %c0_i32 = arith.constant 0 : i32
    %c0_i32_0 = arith.constant 0 : i32
    %c0_i32_1 = arith.constant 0 : i32
    return %c0_i32, %c0_i32_0 : i32, i32
  }
  func.func @transform_7(%arg0: i32) -> (i32, i32) {
    %c0_i32 = arith.constant 0 : i32
    %c0_i32_0 = arith.constant 0 : i32
    %c0_i32_1 = arith.constant 0 : i32
    return %c0_i32, %c0_i32_0 : i32, i32
  }
  func.func @transform_8(%arg0: i32) -> (i32, i32) {
    %c0_i32 = arith.constant 0 : i32
    %c0_i32_0 = arith.constant 0 : i32
    %c0_i32_1 = arith.constant 0 : i32
    return %c0_i32, %c0_i32_0 : i32, i32
  }
  func.func @transform_9(%arg0: i32) -> (i32, i32) {
    %c0_i32 = arith.constant 0 : i32
    %c0_i32_0 = arith.constant 0 : i32
    %c0_i32_1 = arith.constant 0 : i32
    return %c0_i32, %c0_i32_0 : i32, i32
  }
  func.func @transform_10(%arg0: i32) -> (i32, i32, i32, i32) {
    %c0_i32 = arith.constant 0 : i32
    %c0_i32_0 = arith.constant 0 : i32
    %c0_i32_1 = arith.constant 0 : i32
    %c0_i32_2 = arith.constant 0 : i32
    return %arg0, %c0_i32, %c0_i32_0, %c0_i32_1 : i32, i32, i32, i32
  }
  func.func @transform_11(%arg0: i32) -> (i32, i32, i32) {
    %c0_i32 = arith.constant 0 : i32
    %c0_i32_0 = arith.constant 0 : i32
    %c0_i32_1 = arith.constant 0 : i32
    return %arg0, %c0_i32, %c0_i32_0 : i32, i32, i32
  }
}

</mosaic_0001>

<bundles_post_ra>
// kernel: tpu_custom_call.1
= control target key start
LH: loop header
LB: loop body
LE: loop exit
PB: predicated region body
PF: predicated region fallthrough
CT: control target
= control target key end

     0   :  { %s3652_s17 = smov 0   ;;  %s4319_s0 = inlined_call_operand.vmem [shape: f32[2,32,16], index: 0, kind: input, shape index: {}]   ;;  %s4320_s1 = inlined_call_operand.vmem [shape: f32[2,32,16], index: 1, kind: input, shape index: {}]   ;;  %s4321_s2 = inlined_call_operand.vmem [shape: f32[32,32], index: 2, kind: input, shape index: {}]   ;;  %s4322_s3 = inlined_call_operand.vmem [shape: f32[64,32], index: 3, kind: input, shape index: {}]   ;;  %s4323_s4 = inlined_call_operand.vmem [shape: f32[1,32], index: 4, kind: input, shape index: {}]   ;;  %s4324_s5 = inlined_call_operand.vmem [shape: f32[1,64], index: 5, kind: input, shape index: {}]   ;;  %s4325_s6 = inlined_call_operand.vmem [shape: f32[32,32], index: 6, kind: input, shape index: {}]   ;;  %s4326_s7 = inlined_call_operand.vmem [shape: f32[32,1], index: 7, kind: input, shape index: {}]   ;;  %s4327_s8 = inlined_call_operand.vmem [shape: f32[31,8], index: 8, kind: input, shape index: {}]   ;;  %s4328_s9 = inlined_call_operand.vmem [shape: f32[31,8], index: 9, kind: input, shape index: {}]   ;;  %s4329_s10 = inlined_call_operand.vmem [shape: f32[2,1,16,16], index: 10, kind: input, shape index: {}]   ;;  %s4330_s11 = inlined_call_operand.vmem [shape: f32[2,32,16], index: 11, kind: output, shape index: {}]  }
   0x1 LB: > { %s2904_s18 = sadd.s32 4294967295, %s3572_s17   ;;  %p2908_p0 = scmp.ge.s32.totalorder %s3572_s17, 1  ;;  %s3572_s17 = sphi %s3652_s17, %s21_s17  }
   0x2   : > { %p357_p1 = scmp.lt.s32.totalorder %s3572_s17, 3 }
   0x4   : > { %p358_p2 = pnand %p2908_p0, %p357_p1 }
   0x5   : > { %p407_p3 = scmp.lt.s32.totalorder (!%p358_p2), %s2904_s18, 1  ;;  %v435_v0 = vld [vmem:[%s4321_s2] sm:$0xff] (!%p358_p2)  ;;  %vm4331_vm0 = vcmask (!%p358_p2), 261120   ;;  %v436_v14 = vld [vmem:[%s4321_s2 + $0x8] sm:$0xff] (!%p358_p2)  ;;  %v437_v16 = vld [vmem:[%s4321_s2 + $0x10] sm:$0xff] (!%p358_p2)  ;;  %vm771_vm1 = vcmask (!%p358_p2), 64512   ;;  %v766_v58 = vlaneseq (!%p358_p2) }
   0x6   : > { %361 = sbr.rel (%p358_p2) target bundleno = 5614 (0x15ee), region = 64  ;;  %v578_v1 = vld [vmem:[%s4322_s3] sm:$0xff] (!%p358_p2)  ;;  %3117 = vmatprep.mubr.msk.f32.mxu0 (!%p358_p2), %vm4331_vm0, %v435_v0  ;;  %v579_v15 = vld [vmem:[%s4322_s3 + $0x8] sm:$0xff] (!%p358_p2)  ;;  %v580_v17 = vld [vmem:[%s4322_s3 + $0x10] sm:$0xff] (!%p358_p2)  ;;  %s3574_s30 = smov (!%p358_p2), 127   ;;  %vm4336_vm3 = vcmask (!%p358_p2), 244736  }
   0x7   : > { %3131 = vmatprep.mubr.msk.f32.mxu1 (!%p358_p2), %vm4331_vm0, %v578_v1  ;;  %v438_v18 = vld [vmem:[%s4321_s2 + $0x18] sm:$0xff] (!%p358_p2)  ;;  %v582_v20 = vld [vmem:[%s4322_s3 + $0x20] sm:$0xff] (!%p358_p2)  ;;  %v583_v21 = vld [vmem:[%s4322_s3 + $0x28] sm:$0xff] (!%p358_p2)  ;;  %v767_v59 = vshrl.u32 (!%p358_p2), %v766_v58, 7  ;;  %s3575_s12 = smov (!%p358_p2), 126   ;;  %vm4337_vm6 = vcmask (!%p358_p2), 236544  }
   0x8   : > { %v581_v19 = vld [vmem:[%s4322_s3 + $0x18] sm:$0xff] (!%p358_p2)  ;;  %v584_v22 = vld [vmem:[%s4322_s3 + $0x30] sm:$0xff] (!%p358_p2)  ;;  %v756_v24 = vld [vmem:[%s4327_s8] sm:$0xff] (!%p358_p2)  ;;  %s3576_s13 = smov (!%p358_p2), 124   ;;  %vm915_vm9 = vcmask (!%p358_p2), 220160   ;;  %s3577_s20 = smov (!%p358_p2), 120  }
   0x9   : > { %v585_v23 = vld [vmem:[%s4322_s3 + $0x38] sm:$0xff] (!%p358_p2)  ;;  %v757_v25 = vld [vmem:[%s4327_s8 + $0x8] sm:$0xff] (!%p358_p2)  ;;  %v758_v26 = vld [vmem:[%s4327_s8 + $0x10] sm:$0xff] (!%p358_p2)  ;;  %v769_v60 = vsub.s32 (!%p358_p2), 15, %v767_v59  ;;  %v768_v61 = vadd.s32 (!%p358_p2), 8, %v767_v59  ;;  %vm1036_vm13 = vcmask (!%p358_p2), 130048  }
   0xa   : > { %v3730_v27 = vpack.c.bf16 (!%p358_p2), %v757_v25, %v756_v24  ;;  %vm3734_vm2 = vmpackc.low (!%p358_p2), %vm771_vm1, %vm771_vm1  ;;  %v759_v29 = vld [vmem:[%s4327_s8 + $0x18] sm:$0x7f] (!%p358_p2)  ;;  %v2921_v43 = vld [vmem:[%s4323_s4] ss:$0 sm:$0xff] (!%p358_p2)  ;;  %vm4335_vm14 = vcmask (!%p358_p2), 187392   ;;  %s3579_s21 = smov (!%p358_p2), 2  }
   0xb   : > { %v3741_v30 = vpack.c.bf16 (!%p358_p2), %v759_v29, %v758_v26  ;;  %v2930_v45 = vld [vmem:[%s4324_s5] ss:$0 sm:$0xff] (!%p358_p2)  ;;  %v876_v62 = vand.u32 (!%p358_p2), 1, %v769_v60  ;;  %v770_v63 = vsub.s32 (!%p358_p2), 15, %v768_v61  ;;  %s3581_s15 = smov (!%p358_p2), 4   ;;  %s3582_s16 = smov (!%p358_p2), 96  }
   0xc   : > { %s3584_s22 = smov (!%p358_p2), 112   ;;  %s3585_s24 = smov (!%p358_p2), 88   ;;  %v2694_v25 = vld [vmem:[%s4326_s7] sm:$0xff] (!%p358_p2) }
   0xd   : > { %s4389_s18 = smov (!%p407_p3, %s2904_s18), 1  ;;  %vm3797_vm4 = vcmp.gt.s32.totalorder %v876_v62, 0  ;;  %v877_v1 = vand.u32 1, %v770_v63  ;;  %s3586_s25 = smov 104  }
   0xe   : > { %s3671_s23 = sshll.u32 %s4389_s18, 5  ;;  %s3001_s14 = sshll.u32 %s4389_s18, 4 }
   0xf   : > { %s411_s26 = scalar_lea.vmem %s4319_s0, %s3671_s23  ;;  %s416_s29 = scalar_lea.vmem %s4320_s1, %s3671_s23  ;;  %vm3805_vm5 = vcmp.gt.s32.totalorder %v877_v1, 0 }
  0x10   : > { %v427_v2 = vld [vmem:[%s411_s26] sm:$0xff]  ;;  %v428_v3 = vld [vmem:[%s411_s26 + $0x8] sm:$0xff]  ;;  %v429_v7 = vld [vmem:[%s411_s26 + $0x10] sm:$0xff]  ;;  %s421_s19 = scalar_lea.vmem %s4329_s10, %s3001_s14  ;;  %s3578_s18 = smov 1  }
  0x11   : > { %v431_v4 = vld [vmem:[%s416_s29] sm:$0xff]  ;;  %v3297_v5 = vpack.c.bf16 %v428_v3, %v427_v2  ;;  %v432_v6 = vld [vmem:[%s416_s29 + $0x8] sm:$0xff]  ;;  %v430_v8 = vld [vmem:[%s411_s26 + $0x18] sm:$0xff]  ;;  %s3587_s26 = smov 80  }
  0x12   : > { %v3305_v9 = vpack.c.bf16 %v432_v6, %v431_v4  ;;  %v3301_v10 = vpack.c.bf16 %v430_v8, %v429_v7  ;;  %v433_v11 = vld [vmem:[%s416_s29 + $0x10] sm:$0xff]  ;;  %v434_v12 = vld [vmem:[%s416_s29 + $0x18] sm:$0xff] }
  0x13   : > { %3298 = vmatprep.subr.bf16.mxu0 %v3297_v5  ;;  %v3309_v13 = vpack.c.bf16 %v434_v12, %v433_v11  ;;  %v898_v11 = vand.u32 2, %v770_v63 }
  0x14   : > { %3306 = vmatprep.subr.bf16.mxu1 %v3305_v9  ;;  %3300 = vmatpush3.bf16.msra.mxu0 %v3297_v5 }
  0x15   : > { %3308 = vmatpush3.bf16.msra.mxu1 %v3305_v9  ;;  %3302 = vmatprep.subr.bf16.mxu0 %v3301_v10  ;;  %v897_v9 = vand.u32 2, %v769_v60  ;;  %vm3821_vm8 = vcmp.gt.s32.totalorder %v898_v11, 0 }
  0x16   : > { %3310 = vmatprep.subr.bf16.mxu1 %v3309_v13 }
  0x17   : > { %vm3813_vm7 = vcmp.gt.s32.totalorder %v897_v9, 0 }
  0x18   : > { %3304 = vmatpush3.bf16.msra.mxu0 %v3301_v10 }
  0x19   : > { %3312 = vmatpush3.bf16.msra.mxu1 %v3309_v13  ;;  %3315 = vmatprep.subr.msk.bf16.mxu0 %vm3734_vm2, %v3730_v27 }
  0x1b   : > { %3118 = vmatmul.mubr.msk.f32.vlgmr.msra.gmra.mrb[0].mxu0 %vm4331_vm0, %v436_v14 }
  0x1c   : > { %3132 = vmatmul.mubr.msk.f32.vlgmr.msra.gmra.mrb[0].mxu1 %vm4331_vm0, %v579_v15  ;;  %3120 = vmatprep.mubr.msk.f32.mxu0 %vm4331_vm0, %v437_v16 }
  0x1d   : > { %3134 = vmatprep.mubr.msk.f32.mxu1 %vm4331_vm0, %v580_v17 }
  0x1f   : > { %3121 = vmatmul.mubr.msk.f32.gmra.mrb[2].mxu0 %vm4331_vm0, %v438_v18 }
  0x20   : > { %3135 = vmatmul.mubr.msk.f32.gmra.mrb[2].mxu1 %vm4331_vm0, %v581_v19  ;;  %v918_v19 = vand.u32 4, %v769_v60 }
  0x21   : > { %3137 = vmatprep.mubr.msk.f32.mxu1 %vm4331_vm0, %v582_v20  ;;  %3318 = vmatpush3.bf16.xpose.msk.msra.mxu0 %vm3734_vm2, %v3730_v27 }
  0x22   : > { %3321 = vmatprep.subr.msk.bf16.mxu0 %vm3734_vm2, %v3741_v30  ;;  %vm3829_vm10 = vcmp.gt.s32.totalorder %v918_v19, 0  ;;  %v762_v19 = vld [vmem:[%s4328_s9 + $0x10] sm:$0xff] }
  0x24   : > { %3138 = vmatmul.mubr.msk.f32.gmra.mrb[4].mxu1 %vm4331_vm0, %v583_v21  ;;  %v919_v21 = vand.u32 4, %v770_v63 }
  0x25   : > { %3140 = vmatprep.mubr.msk.f32.mxu1 %vm4331_vm0, %v584_v22 }
  0x26   : > { %vm3841_vm11 = vcmp.gt.s32.totalorder %v919_v21, 0  ;;  %v763_v21 = vld [vmem:[%s4328_s9 + $0x18] sm:$0x7f] }
  0x28   : > { %3141 = vmatmul.mubr.msk.f32.gmra.mrb[6].mxu1 %vm4331_vm0, %v585_v23  ;;  %vm4332_vm0 = vcmask 7168  }
  0x29   : > { %3324 = vmatpush3.bf16.xpose.msk.msra.mxu0 %vm3734_vm2, %v3741_v30 }
  0xee   : > { %v3119_v31 = vpop.f32.mrb[0].mxu0 }
  0xef   : > { %v3133_v32 = vpop.f32.mrb[0].mxu1  ;;  %v518_v33 = vpop.f32.mrb[1].mxu0 }
  0xf0   : > { %v676_v34 = vpop.f32.mrb[1].mxu1  ;;  %537 = vxpose.xlu0.b32.start [1/4] (short) (narrow) %v518_v33, 16 }
  0xf1   : > { %715 = vxpose.xlu1.b32.start [1/8] (short) (narrow) %v676_v34, 16 }
  0xf2   : > { %v3122_v35 = vpop.f32.mrb[2].mxu0 }
  0xf3   : > { %v528_v36 = vpop.f32.mrb[3].mxu0  ;;  %v3136_v37 = vpop.f32.mrb[2].mxu1 }
  0xf4   : > { %538 = vxpose.xlu0.b32.cont [2/4] (short) (narrow) %v3119_v31, 16  ;;  %v686_v38 = vpop.f32.mrb[3].mxu1  ;;  %v3846_v31 = vld [vmem:[%s421_s19 + $0x8] sm:$0xff] }
  0xf5   : > { %716 = vxpose.xlu1.b32.cont [2/8] (short) (narrow) %v3133_v32, 16  ;;  %vm4333_vm12 = vcmp.eq.f32.partialorder %v3846_v31, 0.0 }
  0xf7   : > { %v3139_v39 = vpop.f32.mrb[4].mxu1 }
  0xf8   : > { %539 = vxpose.xlu0.b32.cont [3/4] (short) (narrow) %v528_v36, 16  ;;  %v696_v40 = vpop.f32.mrb[5].mxu1 }
  0xf9   : > { %717 = vxpose.xlu1.b32.cont [3/8] (short) (narrow) %v686_v38, 16  ;;  %v3856_v38 = vld [vmem:[%s421_s19] sm:$0xff]  ;;  %s3583_s19 = smov 8  }
  0xfa   : > { %vm4334_vm15 = vcmp.eq.f32.partialorder %v3856_v38, 0.0 }
  0xfb   : > { %v3142_v41 = vpop.f32.mrb[6].mxu1 }
  0xfc   : > { %540 = vxpose.xlu0.b32.end [4/4] (short) (narrow) %v3122_v35, 16  ;;  %v706_v42 = vpop.f32.mrb[7].mxu1 }
  0xfd   : > { %718 = vxpose.xlu1.b32.cont [4/8] (short) (narrow) %v3136_v37, 16 }
 0x101   : > { %719 = vxpose.xlu1.b32.cont [5/8] (short) (narrow) %v696_v40, 16 }
 0x105   : > { %720 = vxpose.xlu1.b32.cont [6/8] (short) (narrow) %v3139_v39, 16 }
 0x109   : > { %721 = vxpose.xlu1.b32.cont [7/8] (short) (narrow) %v706_v42, 16 }
 0x10d   : > { %722 = vxpose.xlu1.b32.end [8/8] (short) (narrow) %v3142_v41, 16 }
 0x170   : > { %v553_v44 = vpop.trf.xlu0 }
 0x171   : > { %v731_v46 = vpop.trf.xlu1  ;;  %v3761_v47 = vadd.f32 %v2921_v43, %v553_v44 }
 0x172   : > { %v3767_v48 = vadd.f32 %v2930_v45, %v731_v46 }
 0x173   : > { %3151 = vmatprep.mubr.msk.f32.mxu0 %vm771_vm1, %v3761_v47  ;;  %3158 = vmatprep.mubr.msk.f32.mxu1 %vm771_vm1, %v3761_v47 }
 0x174   : > { %v554_v49 = vpop.trf.xlu0 }
 0x175   : > { %v732_v50 = vpop.trf.xlu1  ;;  %v3769_v51 = vadd.f32 %v2921_v43, %v554_v49 }
 0x176   : > { %v3771_v52 = vadd.f32 %v2930_v45, %v732_v50 }
 0x177   : > { %3152 = vmatmul.mubr.msk.f32.vlgmr.msra.gmra.mrb[4].mxu0 %vm771_vm1, %v3769_v51 }
 0x178   : > { %v3325_v53 = vpack.c.bf16 %v3771_v52, %v3767_v48 }
 0x17a   : > { %3327 = vmatprep.subr.msk.bf16.mxu1 %vm3734_vm2, %v3325_v53 }
 0x17b   : > { %3330 = vmatpush3.bf16.xpose.msk.msra.mxu1 %vm3734_vm2, %v3325_v53 }
 0x17c   : > { %3347 = vmatprep.subr.msk.bf16.mxu1 %vm3734_vm2, %v3730_v27 }
 0x182   : > { %3159 = vmatmul.mubr.msk.f32.vlgmr.msra.gmra.mrb[8].mxu1 %vm771_vm1, %v3769_v51 }
 0x183   : > { %3350 = vmatpush3.bf16.xpose.msk.msra.mxu1 %vm3734_vm2, %v3730_v27 }
 0x184   : > { %3353 = vmatprep.subr.msk.bf16.mxu1 %vm3734_vm2, %v3741_v30 }
 0x18b   : > { %3356 = vmatpush3.bf16.xpose.msk.msra.mxu1 %vm3734_vm2, %v3741_v30 }
 0x24a   : > { %v3153_v54 = vpop.f32.mrb[4].mxu0 }
 0x24b   : > { %v856_v55 = vpop.f32.mrb[5].mxu0 }
 0x24c   : > { %867 = vrot.lane.b32.xlu0 %v856_v55, %s3574_s30 }
 0x250   : > { %869 = vrot.lane.b32.xlu0 %v3153_v54, %s3574_s30 }
 0x255   : > { %v3160_v56 = vpop.f32.mrb[8].mxu1 }
 0x256   : > { %v1021_v57 = vpop.f32.mrb[9].mxu1 }
 0x2be   : > { %v868_v2 = vpop.permute.xlu0 %867 }
 0x2bf   : > { %v874_v3 = vsel %vm4336_vm3, %v868_v2, 0.0 }
 0x2c0   : > { %v884_v4 = vsel %vm3797_vm4, %v874_v3, %v856_v55 }
 0x2c1   : > { %888 = vrot.lane.b32.xlu1 %v884_v4, %s3575_s12 }
 0x2c2   : > { %v870_v6 = vpop.permute.xlu0 %869 }
 0x2c3   : > { %v875_v7 = vsel %vm4336_vm3, %v870_v6, 0.0 }
 0x2c4   : > { %v885_v8 = vsel %vm3805_vm5, %v875_v7, %v3153_v54 }
 0x2c5   : > { %890 = vrot.lane.b32.xlu1 %v885_v8, %s3575_s12 }
 0x333   : > { %v889_v12 = vpop.permute.xlu1 %888 }
 0x334   : > { %v895_v13 = vsel %vm4337_vm6, %v889_v12, 0.0 }
 0x335   : > { %v905_v14 = vsel %vm3813_vm7, %v895_v13, %v884_v4 }
 0x336   : > { %909 = vrot.lane.b32.xlu0 %v905_v14, %s3576_s13 }
 0x337   : > { %v891_v16 = vpop.permute.xlu1 %890 }
 0x338   : > { %v896_v17 = vsel %vm4337_vm6, %v891_v16, 0.0  ;;  %v760_v16 = vld [vmem:[%s4328_s9] sm:$0xff] }
 0x339   : > { %v906_v18 = vsel %vm3821_vm8, %v896_v17, %v885_v8  ;;  %v761_v17 = vld [vmem:[%s4328_s9 + $0x8] sm:$0xff] }
 0x33a   : > { %911 = vrot.lane.b32.xlu1 %v906_v18, %s3576_s13 }
 0x3a8   : > { %v910_v22 = vpop.permute.xlu0 %909 }
 0x3a9   : > { %v916_v23 = vsel %vm915_vm9, %v910_v22, 0.0  ;;  %v3914_v22 = vpack.c.bf16 %v763_v21, %v762_v19 }
 0x3aa   : > { %v926_v24 = vsel %vm3829_vm10, %v916_v23, %v905_v14 }
 0x3ab   : > { %930 = vrot.lane.b32.xlu0 %v926_v24, %s3577_s20 }
 0x3ac   : > { %v912_v26 = vpop.permute.xlu1 %911 }
 0x3ad   : > { %v917_v29 = vsel %vm915_vm9, %v912_v26, 0.0 }
 0x3ae   : > { %v927_v32 = vsel %vm3841_vm11, %v917_v29, %v906_v18  ;;  %v3902_v18 = vpack.c.bf16 %v761_v17, %v760_v16 }
 0x3af   : > { %v1027_v33 = vadd.f32 %v3160_v56, %v927_v32 }
 0x3b0   : > { %3332 = vmatprep.subr.bf16.mxu0 %v3902_v18  ;;  %3364 = vmatprep.subr.bf16.mxu1 %v3902_v18 }
 0x3b1   : > { %v1031_v34 = vmul.f32 0.35355338, %v1027_v33  ;;  %3334 = vmatpush3.bf16.msra.mxu0 %v3902_v18  ;;  %v3938_v33 = vpack.i.bf16 %v3771_v52, %v3767_v48 }
 0x3b3   : > { %v1035_v35 = vsel %vm4333_vm12, -10000.0, %v1031_v34  ;;  %vm3580_vm12 = vmmov 1  }
 0x3b4   : > { %v1040_v36 = vsel %vm1036_vm13, %v1035_v35, -inf }
 0x3b5   : > { %1041 = vmax.xlane.f32.xlu1 %v1040_v36 }
 0x3c6   : > { %1287 = vrot.lane.b32.xlu1 %v3769_v51, %s3577_s20 }
 0x41d   : > { %v931_v37 = vpop.permute.xlu0 %930 }
 0x41e   : > { %v937_v39 = vsel %vm4335_vm14, %v931_v37, 0.0  ;;  %vm1082_vm14 = vcmask 15360  }
 0x41f   : > { %v1022_v40 = vadd.f32 %v1021_v57, %v937_v39 }
 0x421   : > { %v1030_v41 = vmul.f32 0.35355338, %v1022_v40 }
 0x423   : > { %v1034_v42 = vsel %vm4334_vm15, -10000.0, %v1030_v41 }
 0x424   : > { %v1037_v43 = vsel %vm1036_vm13, %v1034_v42, -inf }
 0x425   : > { %1038 = vmax.xlane.f32.xlu0 %v1037_v43 }
 0x442   : > { %v1042_v44 = vpop.xlane.xlu1 %1041 }
 0x443   : > { %v1044_v45 = vsub.f32 %v1035_v35, %v1042_v44 }
 0x445   : > { %v1047_v46 = vmul.f32 1.442695, %v1044_v45 }
 0x446   : > { %v3867_v58 = vpop.permute.xlu1 %1287 }
 0x447   : > { %3534 = vpow2.f32 %v1047_v46 }
 0x451   : > { %v3535_v49 = vpop.eup %3534 }
 0x452   : > { %v1052_v50 = vsel %vm1036_vm13, %v3535_v49, 0.0 }
 0x453   : > { %1053 = vadd.xlane.f32.xlu1 %v1052_v50 }
 0x4b2   : > { %v1039_v53 = vpop.xlane.xlu0 %1038 }
 0x4b3   : > { %v1043_v54 = vsub.f32 %v1034_v42, %v1039_v53 }
 0x4b5   : > { %v1045_v55 = vmul.f32 1.442695, %v1043_v54 }
 0x4b7   : > { %3536 = vpow2.f32 %v1045_v55 }
 0x4c1   : > { %v3537_v56 = vpop.eup %3536 }
 0x4c2   : > { %v1049_v57 = vsel %vm1036_vm13, %v3537_v56, 0.0 }
 0x4c3   : > { %1050 = vadd.xlane.f32.xlu0 %v1049_v57 }
 0x4d9   : > { %1285 = vrot.lane.b32.xlu0 %v3761_v47, %s3577_s20 }
 0x4e0   : > { %v1054_v59 = vpop.xlane.xlu1 %1053 }
 0x4e1   : > { %3538 = vrcp.f32 %v1054_v59 }
 0x4eb   : > { %v3539_v62 = vpop.eup %3538 }
 0x4ec   : > { %v3879_v3 = vmul.f32 %v3539_v62, %v3535_v49 }
 0x4ee   : > { %v1060_v4 = vsel %vm1036_vm13, %v3879_v3, 0.0 }
 0x550   : > { %v1051_v60 = vpop.xlane.xlu0 %1050 }
 0x551   : > { %3540 = vrcp.f32 %v1051_v60 }
 0x554   : > { %v3869_v61 = vpop.permute.xlu0 %1285 }
 0x555   : > { %3187 = vmatprep.mubr.msk.f32.mxu1 %vm771_vm1, %v3869_v61 }
 0x556   : > { %3188 = vmatmul.mubr.msk.f32.vlgmr.msra.gmra.mrb[10].mxu1 %vm771_vm1, %v3867_v58 }
 0x557   : > { %3366 = vmatpush3.bf16.msra.mxu1 %v3902_v18 }
 0x55b   : > { %v3541_v63 = vpop.eup %3540 }
 0x55c   : > { %v3875_v1 = vmul.f32 %v3541_v63, %v3537_v56 }
 0x55e   : > { %v1059_v2 = vsel %vm1036_vm13, %v3875_v1, 0.0 }
 0x55f   : > { %1063 = vrot.lane.b32.xlu0 %v1059_v2, %s3578_s18 }
 0x563   : > { %1065 = vrot.lane.b32.xlu0 %v1060_v4, %s3578_s18 }
 0x5d1   : > { %v1064_v6 = vpop.permute.xlu0 %1063 }
 0x5d2   : > { %v1070_v7 = vsel %vm4332_vm0, 0.0, %v1064_v6 }
 0x5d3   : > { %v1072_v8 = vsel %vm3797_vm4, %v1070_v7, %v1059_v2 }
 0x5d4   : > { %1076 = vrot.lane.b32.xlu0 %v1072_v8, %s3579_s21 }
 0x5d5   : > { %v1066_v9 = vpop.permute.xlu0 %1065 }
 0x5d6   : > { %v1071_v11 = vsel %vm4332_vm0, 0.0, %v1066_v9  ;;  %vm1119_vm0 = vcmask 1046528  }
 0x5d7   : > { %v1073_v12 = vsel %vm3805_vm5, %v1071_v11, %v1060_v4  ;;  %vm3916_vm15 = vmpackc.low %vm1119_vm0, %vm3580_vm12  ;;  %vm1095_vm0 = vcmask 31744   ;;  %vm4338_vm12 = vcmask 252928  }
 0x5d8   : > { %1078 = vrot.lane.b32.xlu0 %v1073_v12, %s3579_s21  ;;  %3337 = vmatprep.subr.msk.bf16.mxu0 %vm3916_vm15, %v3914_v22 }
 0x5d9   : > { %3369 = vmatprep.subr.msk.bf16.mxu1 %vm3916_vm15, %v3914_v22  ;;  %3340 = vmatpush3.bf16.msk.msra.mxu0 %vm3916_vm15, %v3914_v22 }
 0x5da   : > { %3372 = vmatpush3.bf16.msk.msra.mxu1 %vm3916_vm15, %v3914_v22 }
 0x629   : > { %v3893_v13 = vpop.f32.mrb[10].mxu1 }
 0x62a   : > { %v1359_v14 = vpop.f32.mrb[11].mxu1 }
 0x62b   : > { %1370 = vrot.lane.b32.xlu1 %v1359_v14, %s3574_s30 }
 0x646   : > { %v1077_v24 = vpop.permute.xlu0 %1076 }
 0x647   : > { %v1083_v26 = vsel %vm1082_vm14, 0.0, %v1077_v24 }
 0x648   : > { %v1085_v29 = vsel %vm3813_vm7, %v1083_v26, %v1072_v8 }
 0x649   : > { %1089 = vrot.lane.b32.xlu0 %v1085_v29, %s3581_s15 }
 0x64a   : > { %v1079_v32 = vpop.permute.xlu0 %1078 }
 0x64b   : > { %v1084_v34 = vsel %vm1082_vm14, 0.0, %v1079_v32 }
 0x64c   : > { %v1086_v35 = vsel %vm3821_vm8, %v1084_v34, %v1073_v12 }
 0x64d   : > { %3483 = vrot.lane.b32.xlu0 %v3938_v33, %s3582_s16 }
 0x651   : > { %1091 = vrot.lane.b32.xlu0 %v1086_v35, %s3581_s15 }
 0x69d   : > { %v1371_v48 = vpop.permute.xlu1 %1370 }
 0x69e   : > { %v1376_v42 = vsel %vm4336_vm3, %v1371_v48, 0.0 }
 0x69f   : > { %v1378_v44 = vsel %vm3797_vm4, %v1376_v42, %v1359_v14 }
 0x6bb   : > { %v1090_v36 = vpop.permute.xlu0 %1089 }
 0x6bc   : > { %v1096_v37 = vsel %vm1095_vm0, 0.0, %v1090_v36 }
 0x6bd   : > { %v1098_v39 = vsel %vm3829_vm10, %v1096_v37, %v1085_v29 }
 0x6be   : > { %1102 = vrot.lane.b32.xlu0 %v1098_v39, %s3583_s19 }
 0x6bf   : > { %v3484_v52 = vpop.permute.xlu0 %3483 }
 0x6c0   : > { %v3486_v40 = vunpack.i.h.bf16 %v3484_v52  ;;  %v3485_v41 = vunpack.i.l.bf16 %v3484_v52 }
 0x6c2   : > { %3488 = vrot.lane.b32.xlu0 %v3938_v33, %s3577_s20  ;;  %v3341_v43 = vpack.c.bf16 %v3486_v40, %v3485_v41 }
 0x6c3   : > { %v1092_v45 = vpop.permute.xlu0 %1091 }
 0x6c4   : > { %3342 = vmatprep.subr.bf16.mxu0 %v3341_v43  ;;  %v1097_v46 = vsel %vm1095_vm0, 0.0, %v1092_v45 }
 0x6c5   : > { %v1099_v53 = vsel %vm3841_vm11, %v1097_v46, %v1086_v35 }
 0x6c6   : > { %1382 = vrot.lane.b32.xlu0 %v1378_v44, %s3575_s12 }
 0x6ca   : > { %1372 = vrot.lane.b32.xlu0 %v3893_v13, %s3574_s30 }
 0x730   : > { %v1103_v49 = vpop.permute.xlu0 %1102 }
 0x731   : > { %v1108_v50 = vsel %vm771_vm1, 0.0, %v1103_v49 }
 0x732   : > { %3169 = vmatprep.mubr.msk.f32.mxu0 %vm4338_vm12, %v1108_v50 }
 0x733   : > { %3170 = vmatmul.mubr.msk.f32.vlgmr.msra.gmra.mrb[6].mxu0 %vm4338_vm12, %v1099_v53  ;;  %vm4357_vm12 = vcmp.eq.f32.partialorder %v3846_v31, 0.0 }
 0x734   : > { %3344 = vmatpush3.bf16.msra.mxu0 %v3341_v43  ;;  %3176 = vmatprep.mubr.msk.f32.mxu0 %vm1036_vm13, %v3875_v1  ;;  %v3489_v54 = vpop.permute.xlu0 %3488 }
 0x735   : > { %v3491_v55 = vunpack.i.h.bf16 %v3489_v54  ;;  %v3490_v56 = vunpack.i.l.bf16 %v3489_v54 }
 0x737   : > { %v3357_v57 = vpack.c.bf16 %v3491_v55, %v3490_v56 }
 0x738   : > { %v1383_v59 = vpop.permute.xlu0 %1382 }
 0x739   : > { %v1388_v60 = vsel %vm4337_vm6, %v1383_v59, 0.0  ;;  %3359 = vmatprep.subr.msk.bf16.mxu0 %vm3734_vm2, %v3357_v57 }
 0x73a   : > { %v1390_v62 = vsel %vm3813_vm7, %v1388_v60, %v1378_v44 }
 0x73b   : > { %1394 = vrot.lane.b32.xlu0 %v1390_v62, %s3576_s13  ;;  %3177 = vmatmul.mubr.msk.f32.vlgmr.msra.gmra.mrb[6].mxu0 %vm1036_vm13, %v3879_v3 }
 0x73c   : > { %v1373_v63 = vpop.permute.xlu0 %1372  ;;  %3194 = vmatprep.mubr.msk.f32.mxu0 %vm771_vm1, %v3869_v61 }
 0x73d   : > { %v1377_v1 = vsel %vm4336_vm3, %v1373_v63, 0.0  ;;  %3362 = vmatpush3.bf16.xpose.msk.msra.mxu0 %vm3734_vm2, %v3357_v57  ;;  %vm4355_vm3 = vcmask 187392  }
 0x73e   : > { %v1379_v2 = vsel %vm3805_vm5, %v1377_v1, %v3893_v13  ;;  %3379 = vmatprep.subr.msk.bf16.mxu0 %vm3734_vm2, %v3730_v27 }
 0x73f   : > { %1384 = vrot.lane.b32.xlu0 %v1379_v2, %s3575_s12 }
 0x744   : > { %3195 = vmatmul.mubr.msk.f32.vlgmr.msra.gmra.mrb[8].mxu0 %vm771_vm1, %v3867_v58 }
 0x745   : > { %3382 = vmatpush3.bf16.xpose.msk.msra.mxu0 %vm3734_vm2, %v3730_v27 }
 0x746   : > { %3385 = vmatprep.subr.msk.bf16.mxu0 %vm3734_vm2, %v3741_v30 }
 0x74d   : > { %3388 = vmatpush3.bf16.xpose.msk.msra.mxu0 %vm3734_vm2, %v3741_v30 }
 0x74e   : > { %3396 = vmatprep.subr.bf16.mxu0 %v3902_v18 }
 0x7ad   : > { %v1395_v61 = vpop.permute.xlu0 %1394 }
 0x7ae   : > { %v1400_v3 = vsel %vm915_vm9, %v1395_v61, 0.0 }
 0x7af   : > { %v1402_v58 = vsel %vm3829_vm10, %v1400_v3, %v1390_v62 }
 0x7b0   : > { %1406 = vrot.lane.b32.xlu1 %v1402_v58, %s3577_s20 }
 0x7b1   : > { %v1385_v4 = vpop.permute.xlu0 %1384 }
 0x7b2   : > { %v1389_v6 = vsel %vm4337_vm6, %v1385_v4, 0.0  ;;  %vm4356_vm6 = vcmp.eq.f32.partialorder %v3856_v38, 0.0 }
 0x7b3   : > { %v1391_v7 = vsel %vm3821_vm8, %v1389_v6, %v1379_v2 }
 0x7b4   : > { %1396 = vrot.lane.b32.xlu0 %v1391_v7, %s3576_s13 }
 0x80e   : > { %v4005_v8 = vpop.f32.mrb[6].mxu0 }
 0x80f   : > { %v4007_v9 = vpop.f32.mrb[7].mxu0 }
 0x817   : > { %v3196_v11 = vpop.f32.mrb[8].mxu0 }
 0x818   : > { %v1490_v12 = vpop.f32.mrb[9].mxu0 }
 0x822   : > { %v1407_v13 = vpop.permute.xlu1 %1406 }
 0x823   : > { %v1412_v14 = vsel %vm4355_vm3, %v1407_v13, 0.0  ;;  %vm4358_vm3 = vcmask 7168  }
 0x824   : > { %v1491_v16 = vadd.f32 %v1490_v12, %v1412_v14 }
 0x826   : > { %v1499_v17 = vmul.f32 0.35355338, %v1491_v16  ;;  %v1397_v19 = vpop.permute.xlu0 %1396 }
 0x827   : > { %v1401_v21 = vsel %vm915_vm9, %v1397_v19, 0.0 }
 0x828   : > { %v1403_v24 = vsel %vm3841_vm11, %v1401_v21, %v1391_v7  ;;  %v1501_v26 = vsel %vm4356_vm6, -10000.0, %v1499_v17  ;;  %vm4359_vm6 = vmmov %vm4358_vm3 }
 0x829   : > { %v1496_v29 = vadd.f32 %v3196_v11, %v1403_v24  ;;  %v1503_v32 = vsel %vm1036_vm13, %v1501_v26, -inf }
 0x82a   : > { %1504 = vmax.xlane.f32.xlu1 %v1503_v32 }
 0x82b   : > { %v1500_v34 = vmul.f32 0.35355338, %v1496_v29 }
 0x82d   : > { %v1502_v35 = vsel %vm4357_vm12, -10000.0, %v1500_v34  ;;  %vm4360_vm12 = vcmask 252928  }
 0x82e   : > { %v1506_v36 = vsel %vm1036_vm13, %v1502_v35, -inf }
 0x82f   : > { %1507 = vmax.xlane.f32.xlu0 %v1506_v36 }
 0x83b   : > { %1743 = vrot.lane.b32.xlu1 %v3761_v47, %s3584_s22 }
 0x8b7   : > { %v1505_v37 = vpop.xlane.xlu1 %1504 }
 0x8b8   : > { %v1509_v39 = vsub.f32 %v1501_v26, %v1505_v37 }
 0x8ba   : > { %v1511_v48 = vmul.f32 1.442695, %v1509_v39 }
 0x8bb   : > { %v4020_v52 = vpop.permute.xlu1 %1743 }
 0x8bc   : > { %3542 = vpow2.f32 %v1511_v48  ;;  %v1508_v40 = vpop.xlane.xlu0 %1507  ;;  %3223 = vmatprep.mubr.msk.f32.mxu0 %vm771_vm1, %v4020_v52 }
 0x8bd   : > { %v1510_v41 = vsub.f32 %v1502_v35, %v1508_v40 }
 0x8bf   : > { %v1513_v42 = vmul.f32 1.442695, %v1510_v41 }
 0x8c1   : > { %3544 = vpow2.f32 %v1513_v42 }
 0x8c6   : > { %v3543_v43 = vpop.eup %3542 }
 0x8c7   : > { %v1515_v44 = vsel %vm1036_vm13, %v3543_v43, 0.0 }
 0x8c8   : > { %1516 = vadd.xlane.f32.xlu0 %v1515_v44 }
 0x8cb   : > { %v3545_v45 = vpop.eup %3544 }
 0x8cc   : > { %v1518_v46 = vsel %vm1036_vm13, %v3545_v45, 0.0 }
 0x8cd   : > { %1519 = vadd.xlane.f32.xlu1 %v1518_v46 }
 0x8de   : > { %3498 = vrot.lane.b32.xlu1 %v3938_v33, %s3584_s22  ;;  %1745 = vrot.lane.b32.xlu0 %v3769_v51, %s3584_s22 }
 0x955   : > { %v1517_v49 = vpop.xlane.xlu0 %1516 }
 0x956   : > { %3546 = vrcp.f32 %v1517_v49 }
 0x959   : > { %v4028_v50 = vpop.permute.xlu0 %1745 }
 0x95a   : > { %3224 = vmatmul.mubr.msk.f32.vlgmr.msra.gmra.mrb[10].mxu0 %vm771_vm1, %v4028_v50  ;;  %v1520_v53 = vpop.xlane.xlu1 %1519 }
 0x95b   : > { %3548 = vrcp.f32 %v1520_v53  ;;  %3398 = vmatpush3.bf16.msra.mxu0 %v3902_v18 }
 0x95c   : > { %3401 = vmatprep.subr.msk.bf16.mxu0 %vm3916_vm15, %v3914_v22 }
 0x95e   : > { %v3499_v32 = vpop.permute.xlu1 %3498 }
 0x95f   : > { %3404 = vmatpush3.bf16.msk.msra.mxu0 %vm3916_vm15, %v3914_v22  ;;  %v3501_v35 = vunpack.i.h.bf16 %v3499_v32  ;;  %v3500_v36 = vunpack.i.l.bf16 %v3499_v32 }
 0x960   : > { %v3547_v54 = vpop.eup %3546 }
 0x961   : > { %v1523_v55 = vmul.f32 %v3547_v54, %v3543_v43  ;;  %v3389_v41 = vpack.c.bf16 %v3501_v35, %v3500_v36 }
 0x963   : > { %v1525_v56 = vsel %vm1036_vm13, %v1523_v55, 0.0 }
 0x964   : > { %1529 = vrot.lane.b32.xlu0 %v1525_v56, %s3578_s18 }
 0x965   : > { %v3549_v57 = vpop.eup %3548 }
 0x966   : > { %v1524_v59 = vmul.f32 %v3549_v57, %v3545_v45 }
 0x968   : > { %v1526_v60 = vsel %vm1036_vm13, %v1524_v59, 0.0 }
 0x969   : > { %1531 = vrot.lane.b32.xlu0 %v1526_v60, %s3578_s18 }
 0x9d6   : > { %v1530_v62 = vpop.permute.xlu0 %1529 }
 0x9d7   : > { %v1535_v63 = vsel %vm4358_vm3, 0.0, %v1530_v62  ;;  %vm4361_vm3 = vmmov %vm4360_vm12 }
 0x9d8   : > { %v1537_v1 = vsel %vm3797_vm4, %v1535_v63, %v1525_v56 }
 0x9d9   : > { %1541 = vrot.lane.b32.xlu0 %v1537_v1, %s3579_s21 }
 0x9db   : > { %v1532_v2 = vpop.permute.xlu0 %1531 }
 0x9dc   : > { %v1536_v61 = vsel %vm4359_vm6, 0.0, %v1532_v2  ;;  %vm4362_vm6 = vcmask 244736  }
 0x9dd   : > { %v1538_v3 = vsel %vm3805_vm5, %v1536_v61, %v1526_v60 }
 0x9de   : > { %1543 = vrot.lane.b32.xlu0 %v1538_v3, %s3579_s21 }
 0xa2d   : > { %v3225_v58 = vpop.f32.mrb[10].mxu0 }
 0xa2e   : > { %v1817_v4 = vpop.f32.mrb[11].mxu0 }
 0xa4b   : > { %v1542_v6 = vpop.permute.xlu0 %1541 }
 0xa4c   : > { %v1547_v7 = vsel %vm1082_vm14, 0.0, %v1542_v6 }
 0xa4d   : > { %v1549_v11 = vsel %vm3813_vm7, %v1547_v7, %v1537_v1 }
 0xa4e   : > { %1553 = vrot.lane.b32.xlu0 %v1549_v11, %s3581_s15 }
 0xa50   : > { %v1544_v12 = vpop.permute.xlu0 %1543 }
 0xa51   : > { %v1548_v13 = vsel %vm1082_vm14, 0.0, %v1544_v12 }
 0xa52   : > { %3493 = vrot.lane.b32.xlu0 %v3938_v33, %s3585_s24  ;;  %v1550_v14 = vsel %vm3821_vm8, %v1548_v13, %v1538_v3 }
 0xa56   : > { %1555 = vrot.lane.b32.xlu0 %v1550_v14, %s3581_s15 }
 0xac0   : > { %v1554_v16 = vpop.permute.xlu0 %1553 }
 0xac1   : > { %v1559_v17 = vsel %vm1095_vm0, 0.0, %v1554_v16 }
 0xac2   : > { %v1561_v19 = vsel %vm3829_vm10, %v1559_v17, %v1549_v11 }
 0xac3   : > { %1565 = vrot.lane.b32.xlu0 %v1561_v19, %s3583_s19 }
 0xac4   : > { %v3494_v21 = vpop.permute.xlu0 %3493 }
 0xac5   : > { %v3496_v24 = vunpack.i.h.bf16 %v3494_v21  ;;  %v3495_v26 = vunpack.i.l.bf16 %v3494_v21 }
 0xac7   : > { %v3373_v29 = vpack.c.bf16 %v3496_v24, %v3495_v26  ;;  %1828 = vrot.lane.b32.xlu0 %v1817_v4, %s3574_s30 }
 0xac8   : > { %v1556_v34 = vpop.permute.xlu0 %1555 }
 0xac9   : > { %3374 = vmatprep.subr.bf16.mxu1 %v3373_v29  ;;  %v1560_v37 = vsel %vm1095_vm0, 0.0, %v1556_v34 }
 0xaca   : > { %v1562_v40 = vsel %vm3841_vm11, %v1560_v37, %v1550_v14 }
 0xb35   : > { %v1566_v39 = vpop.permute.xlu0 %1565 }
 0xb36   : > { %v1571_v48 = vsel %vm771_vm1, 0.0, %v1566_v39 }
 0xb37   : > { %3205 = vmatprep.mubr.msk.f32.mxu1 %vm4360_vm12, %v1571_v48  ;;  %vm4363_vm12 = vcmask 236544  }
 0xb38   : > { %3206 = vmatmul.mubr.msk.f32.vlgmr.msra.gmra.mrb[12].mxu1 %vm4361_vm3, %v1562_v40  ;;  %vm4364_vm3 = vmmov %vm4362_vm6 }
 0xb39   : > { %3376 = vmatpush3.bf16.msra.mxu1 %v3373_v29  ;;  %3212 = vmatprep.mubr.msk.f32.mxu1 %vm1036_vm13, %v1523_v55  ;;  %v1829_v42 = vpop.permute.xlu0 %1828 }
 0xb3a   : > { %v1834_v43 = vsel %vm4362_vm6, %v1829_v42, 0.0  ;;  %3391 = vmatprep.subr.msk.bf16.mxu1 %vm3734_vm2, %v3389_v41  ;;  %vm4365_vm6 = vmmov %vm4363_vm12 }
 0xb3b   : > { %v1836_v44 = vsel %vm3797_vm4, %v1834_v43, %v1817_v4 }
 0xb3c   : > { %1840 = vrot.lane.b32.xlu0 %v1836_v44, %s3575_s12 }
 0xb40   : > { %1830 = vrot.lane.b32.xlu0 %v3225_v58, %s3574_s30  ;;  %3213 = vmatmul.mubr.msk.f32.vlgmr.msra.gmra.mrb[12].mxu1 %vm1036_vm13, %v1524_v59 }
 0xb41   : > { %3230 = vmatprep.mubr.msk.f32.mxu1 %vm771_vm1, %v4020_v52 }
 0xb42   : > { %3394 = vmatpush3.bf16.xpose.msk.msra.mxu1 %vm3734_vm2, %v3389_v41 }
 0xb43   : > { %3411 = vmatprep.subr.msk.bf16.mxu1 %vm3734_vm2, %v3730_v27 }
 0xb49   : > { %3231 = vmatmul.mubr.msk.f32.vlgmr.msra.gmra.mrb[14].mxu1 %vm771_vm1, %v4028_v50 }
 0xb4a   : > { %3414 = vmatpush3.bf16.xpose.msk.msra.mxu1 %vm3734_vm2, %v3730_v27 }
 0xb4b   : > { %3417 = vmatprep.subr.msk.bf16.mxu1 %vm3734_vm2, %v3741_v30 }
 0xb52   : > { %3420 = vmatpush3.bf16.xpose.msk.msra.mxu1 %vm3734_vm2, %v3741_v30 }
 0xb53   : > { %3428 = vmatprep.subr.bf16.mxu1 %v3902_v18 }
 0xbae   : > { %v1841_v52 = vpop.permute.xlu0 %1840 }
 0xbaf   : > { %v1846_v45 = vsel %vm4363_vm12, %v1841_v52, 0.0  ;;  %vm4366_vm12 = vcmask 187392  }
 0xbb0   : > { %v1848_v46 = vsel %vm3813_vm7, %v1846_v45, %v1836_v44 }
 0xbb1   : > { %1852 = vrot.lane.b32.xlu0 %v1848_v46, %s3576_s13 }
 0xbb2   : > { %v1831_v49 = vpop.permute.xlu0 %1830 }
 0xbb3   : > { %v1835_v27 = vsel %vm4364_vm3, %v1831_v49, 0.0  ;;  %vm4367_vm3 = vcmp.eq.f32.partialorder %v3856_v38, 0.0 }
 0xbb4   : > { %v1837_v50 = vsel %vm3805_vm5, %v1835_v27, %v3225_v58 }
 0xbb5   : > { %1842 = vrot.lane.b32.xlu1 %v1837_v50, %s3575_s12 }
 0xc13   : > { %v4107_v53 = vpop.f32.mrb[12].mxu1 }
 0xc14   : > { %v4109_v30 = vpop.f32.mrb[13].mxu1 }
 0xc15   : > { %v3517_v54 = vpack.i.bf16 %v4107_v53, %v4109_v30  ;;  %v2690_v53 = vld [vmem:[%s4325_s6] sm:$0xff] }
 0xc1c   : > { %v3232_v55 = vpop.f32.mrb[14].mxu1 }
 0xc1d   : > { %v1948_v56 = vpop.f32.mrb[15].mxu1 }
 0xc23   : > { %v1853_v57 = vpop.permute.xlu0 %1852 }
 0xc24   : > { %v1858_v59 = vsel %vm915_vm9, %v1853_v57, 0.0 }
 0xc25   : > { %v1860_v60 = vsel %vm3829_vm10, %v1858_v59, %v1848_v46 }
 0xc26   : > { %1864 = vrot.lane.b32.xlu0 %v1860_v60, %s3577_s20 }
 0xc27   : > { %v1843_v62 = vpop.permute.xlu1 %1842 }
 0xc28   : > { %v1847_v63 = vsel %vm4365_vm6, %v1843_v62, 0.0  ;;  %vm4368_vm6 = vcmp.eq.f32.partialorder %v3846_v31, 0.0 }
 0xc29   : > { %v1849_v1 = vsel %vm3821_vm8, %v1847_v63, %v1837_v50 }
 0xc2a   : > { %1854 = vrot.lane.b32.xlu1 %v1849_v1, %s3576_s13 }
 0xc98   : > { %v1865_v2 = vpop.permute.xlu0 %1864 }
 0xc99   : > { %v1870_v61 = vsel %vm4366_vm12, %v1865_v2, 0.0  ;;  %vm4369_vm12 = vcmask 7168  }
 0xc9a   : > { %v1949_v3 = vadd.f32 %v1948_v56, %v1870_v61 }
 0xc9c   : > { %v1957_v58 = vmul.f32 0.35355338, %v1949_v3  ;;  %v1855_v4 = vpop.permute.xlu1 %1854 }
 0xc9d   : > { %v1859_v6 = vsel %vm915_vm9, %v1855_v4, 0.0 }
 0xc9e   : > { %v1861_v7 = vsel %vm3841_vm11, %v1859_v6, %v1849_v1  ;;  %v1959_v11 = vsel %vm4367_vm3, -10000.0, %v1957_v58  ;;  %vm4371_vm3 = vcmask 244736  }
 0xc9f   : > { %v1954_v12 = vadd.f32 %v3232_v55, %v1861_v7  ;;  %v1961_v13 = vsel %vm1036_vm13, %v1959_v11, -inf }
 0xca0   : > { %1962 = vmax.xlane.f32.xlu0 %v1961_v13 }
 0xca1   : > { %v1958_v14 = vmul.f32 0.35355338, %v1954_v12 }
 0xca3   : > { %v1960_v16 = vsel %vm4368_vm6, -10000.0, %v1958_v14  ;;  %vm4372_vm6 = vcmask 252928  }
 0xca4   : > { %v1964_v17 = vsel %vm1036_vm13, %v1960_v16, -inf }
 0xca5   : > { %1965 = vmax.xlane.f32.xlu1 %v1964_v17 }
 0xcb6   : > { %2203 = vrot.lane.b32.xlu1 %v3769_v51, %s3586_s25 }
 0xd2d   : > { %v1963_v19 = vpop.xlane.xlu0 %1962 }
 0xd2e   : > { %v1967_v21 = vsub.f32 %v1959_v11, %v1963_v19 }
 0xd30   : > { %v1969_v24 = vmul.f32 1.442695, %v1967_v21 }
 0xd32   : > { %3550 = vpow2.f32 %v1969_v24  ;;  %v1966_v26 = vpop.xlane.xlu1 %1965 }
 0xd33   : > { %v1968_v29 = vsub.f32 %v1960_v16, %v1966_v26 }
 0xd35   : > { %v1971_v32 = vmul.f32 1.442695, %v1968_v29 }
 0xd36   : > { %v4137_v39 = vpop.permute.xlu1 %2203 }
 0xd37   : > { %3552 = vpow2.f32 %v1971_v32 }
 0xd3c   : > { %v3551_v34 = vpop.eup %3550 }
 0xd3d   : > { %v1973_v35 = vsel %vm1036_vm13, %v3551_v34, 0.0 }
 0xd3e   : > { %1974 = vadd.xlane.f32.xlu0 %v1973_v35 }
 0xd41   : > { %v3553_v36 = vpop.eup %3552 }
 0xd42   : > { %v1976_v37 = vsel %vm1036_vm13, %v3553_v36, 0.0 }
 0xd43   : > { %1977 = vadd.xlane.f32.xlu1 %v1976_v37 }
 0xd54   : > { %2201 = vrot.lane.b32.xlu0 %v3761_v47, %s3586_s25 }
 0xdcb   : > { %v1975_v51 = vpop.xlane.xlu0 %1974 }
 0xdcc   : > { %3554 = vrcp.f32 %v1975_v51 }
 0xdcf   : > { %v4139_v48 = vpop.permute.xlu0 %2201 }
 0xdd0   : > { %v1978_v40 = vpop.xlane.xlu1 %1977  ;;  %3259 = vmatprep.mubr.msk.f32.mxu1 %vm771_vm1, %v4139_v48 }
 0xdd1   : > { %3556 = vrcp.f32 %v1978_v40  ;;  %3260 = vmatmul.mubr.msk.f32.vlgmr.msra.gmra.mrb[16].mxu1 %vm771_vm1, %v4137_v39 }
 0xdd2   : > { %3430 = vmatpush3.bf16.msra.mxu1 %v3902_v18 }
 0xdd3   : > { %3433 = vmatprep.subr.msk.bf16.mxu1 %vm3916_vm15, %v3914_v22 }
 0xdd6   : > { %v3555_v47 = vpop.eup %3554  ;;  %3436 = vmatpush3.bf16.msk.msra.mxu1 %vm3916_vm15, %v3914_v22  ;;  %vm4370_vm15 = vmmov %vm4369_vm12 }
 0xdd7   : > { %v1981_v41 = vmul.f32 %v3555_v47, %v3551_v34 }
 0xdd9   : > { %v1983_v42 = vsel %vm1036_vm13, %v1981_v41, 0.0 }
 0xdda   : > { %1987 = vrot.lane.b32.xlu0 %v1983_v42, %s3578_s18 }
 0xddb   : > { %v3557_v43 = vpop.eup %3556 }
 0xddc   : > { %v1982_v44 = vmul.f32 %v3557_v43, %v3553_v36 }
 0xdde   : > { %v1984_v52 = vsel %vm1036_vm13, %v1982_v44, 0.0 }
 0xddf   : > { %1989 = vrot.lane.b32.xlu0 %v1984_v52, %s3578_s18 }
 0xe4c   : > { %v1988_v18 = vpop.permute.xlu0 %1987 }
 0xe4d   : > { %v1993_v45 = vsel %vm4369_vm12, 0.0, %v1988_v18  ;;  %vm4373_vm12 = vmmov %vm4372_vm6 }
 0xe4e   : > { %v1995_v46 = vsel %vm3797_vm4, %v1993_v45, %v1983_v42 }
 0xe4f   : > { %1999 = vrot.lane.b32.xlu0 %v1995_v46, %s3579_s21 }
 0xe51   : > { %v1990_v22 = vpop.permute.xlu0 %1989 }
 0xe52   : > { %v1994_v23 = vsel %vm4370_vm15, 0.0, %v1990_v22  ;;  %vm4374_vm15 = vcmask 236544  }
 0xe53   : > { %v1996_v49 = vsel %vm3805_vm5, %v1994_v23, %v1984_v52 }
 0xe54   : > { %2001 = vrot.lane.b32.xlu0 %v1996_v49, %s3579_s21 }
 0xea4   : > { %v3261_v27 = vpop.f32.mrb[16].mxu1 }
 0xea5   : > { %v2275_v50 = vpop.f32.mrb[17].mxu1 }
 0xea6   : > { %2286 = vrot.lane.b32.xlu1 %v2275_v50, %s3574_s30 }
 0xec1   : > { %v2000_v55 = vpop.permute.xlu0 %1999 }
 0xec2   : > { %v2005_v56 = vsel %vm1082_vm14, 0.0, %v2000_v55 }
 0xec3   : > { %v2007_v57 = vsel %vm3813_vm7, %v2005_v56, %v1995_v46 }
 0xec4   : > { %2011 = vrot.lane.b32.xlu0 %v2007_v57, %s3581_s15 }
 0xec6   : > { %v2002_v59 = vpop.permute.xlu0 %2001 }
 0xec7   : > { %v2006_v60 = vsel %vm1082_vm14, 0.0, %v2002_v59 }
 0xec8   : > { %3503 = vrot.lane.b32.xlu0 %v3938_v33, %s3587_s26  ;;  %v2008_v62 = vsel %vm3821_vm8, %v2006_v60, %v1996_v49 }
 0xecc   : > { %2013 = vrot.lane.b32.xlu0 %v2008_v62, %s3581_s15 }
 0xf18   : > { %v2287_v61 = vpop.permute.xlu1 %2286 }
 0xf19   : > { %v2292_v6 = vsel %vm4371_vm3, %v2287_v61, 0.0 }
 0xf1a   : > { %v2294_v11 = vsel %vm3797_vm4, %v2292_v6, %v2275_v50 }
 0xf36   : > { %v2012_v63 = vpop.permute.xlu0 %2011 }
 0xf37   : > { %v2017_v1 = vsel %vm1095_vm0, 0.0, %v2012_v63 }
 0xf38   : > { %v2019_v2 = vsel %vm3829_vm10, %v2017_v1, %v2007_v57 }
 0xf39   : > { %2023 = vrot.lane.b32.xlu0 %v2019_v2, %s3583_s19 }
 0xf3a   : > { %v3504_v3 = vpop.permute.xlu0 %3503 }
 0xf3b   : > { %v3506_v58 = vunpack.i.h.bf16 %v3504_v3  ;;  %v3505_v4 = vunpack.i.l.bf16 %v3504_v3 }
 0xf3d   : > { %v3405_v7 = vpack.c.bf16 %v3506_v58, %v3505_v4  ;;  %3508 = vrot.lane.b32.xlu0 %v3938_v33, %s3586_s25 }
 0xf3e   : > { %v2014_v12 = vpop.permute.xlu0 %2013 }
 0xf3f   : > { %3406 = vmatprep.subr.bf16.mxu0 %v3405_v7  ;;  %v2018_v13 = vsel %vm1095_vm0, 0.0, %v2014_v12 }
 0xf40   : > { %v2020_v17 = vsel %vm3841_vm11, %v2018_v13, %v2008_v62 }
 0xf41   : > { %2298 = vrot.lane.b32.xlu0 %v2294_v11, %s3575_s12 }
 0xf45   : > { %2288 = vrot.lane.b32.xlu0 %v3261_v27, %s3574_s30  ;;  %s3588_s30 = smov 72  }
 0xfab   : > { %v2024_v14 = vpop.permute.xlu0 %2023 }
 0xfac   : > { %v2029_v16 = vsel %vm771_vm1, 0.0, %v2024_v14 }
 0xfad   : > { %3241 = vmatprep.mubr.msk.f32.mxu0 %vm4372_vm6, %v2029_v16  ;;  %vm4375_vm6 = vmmov %vm4374_vm15 }
 0xfae   : > { %3242 = vmatmul.mubr.msk.f32.vlgmr.msra.gmra.mrb[12].mxu0 %vm4373_vm12, %v2020_v17  ;;  %vm4377_vm12 = vcmp.eq.f32.partialorder %v3856_v38, 0.0 }
 0xfaf   : > { %3408 = vmatpush3.bf16.msra.mxu0 %v3405_v7  ;;  %3248 = vmatprep.mubr.msk.f32.mxu0 %vm1036_vm13, %v1981_v41  ;;  %v3509_v19 = vpop.permute.xlu0 %3508 }
 0xfb0   : > { %v3511_v21 = vunpack.i.h.bf16 %v3509_v19  ;;  %v3510_v24 = vunpack.i.l.bf16 %v3509_v19 }
 0xfb2   : > { %v3421_v26 = vpack.c.bf16 %v3511_v21, %v3510_v24 }
 0xfb3   : > { %v2299_v29 = vpop.permute.xlu0 %2298 }
 0xfb4   : > { %v2304_v32 = vsel %vm4374_vm15, %v2299_v29, 0.0  ;;  %3423 = vmatprep.subr.msk.bf16.mxu0 %vm3734_vm2, %v3421_v26  ;;  %vm4378_vm15 = vcmp.eq.f32.partialorder %v3846_v31, 0.0 }
 0xfb5   : > { %v2306_v34 = vsel %vm3813_vm7, %v2304_v32, %v2294_v11 }
 0xfb6   : > { %2310 = vrot.lane.b32.xlu0 %v2306_v34, %s3576_s13  ;;  %3249 = vmatmul.mubr.msk.f32.vlgmr.msra.gmra.mrb[12].mxu0 %vm1036_vm13, %v1982_v44 }
 0xfb7   : > { %v2289_v35 = vpop.permute.xlu0 %2288  ;;  %3266 = vmatprep.mubr.msk.f32.mxu0 %vm771_vm1, %v4139_v48 }
 0xfb8   : > { %v2293_v36 = vsel %vm4371_vm3, %v2289_v35, 0.0  ;;  %3426 = vmatpush3.bf16.xpose.msk.msra.mxu0 %vm3734_vm2, %v3421_v26  ;;  %vm4376_vm2 = vcmask 187392  }
 0xfb9   : > { %v2295_v37 = vsel %vm3805_vm5, %v2293_v36, %v3261_v27 }
 0xfba   : > { %2300 = vrot.lane.b32.xlu0 %v2295_v37, %s3575_s12  ;;  %s3589_s12 = smov 16  }
 0xfbf   : > { %3267 = vmatmul.mubr.msk.f32.vlgmr.msra.gmra.mrb[14].mxu0 %vm771_vm1, %v4137_v39 }
0x1028   : > { %v2311_v51 = vpop.permute.xlu0 %2310 }
0x1029   : > { %v2316_v40 = vsel %vm915_vm9, %v2311_v51, 0.0 }
0x102a   : > { %v2318_v47 = vsel %vm3829_vm10, %v2316_v40, %v2306_v34 }
0x102b   : > { %2322 = vrot.lane.b32.xlu0 %v2318_v47, %s3577_s20 }
0x102c   : > { %v2301_v48 = vpop.permute.xlu0 %2300 }
0x102d   : > { %v2305_v28 = vsel %vm4375_vm6, %v2301_v48, 0.0 }
0x102e   : > { %v2307_v41 = vsel %vm3821_vm8, %v2305_v28, %v2295_v37 }
0x102f   : > { %2312 = vrot.lane.b32.xlu1 %v2307_v41, %s3576_s13 }
0x1089   : > { %v4217_v42 = vpop.f32.mrb[12].mxu0 }
0x108a   : > { %v4219_v43 = vpop.f32.mrb[13].mxu0 }
0x108b   : > { %v3522_v39 = vpack.i.bf16 %v4217_v42, %v4219_v43 }
0x1092   : > { %v3268_v44 = vpop.f32.mrb[14].mxu0 }
0x1093   : > { %v2406_v52 = vpop.f32.mrb[15].mxu0 }
0x109d   : > { %v2323_v18 = vpop.permute.xlu0 %2322 }
0x109e   : > { %v2328_v45 = vsel %vm4376_vm2, %v2323_v18, 0.0  ;;  %v2696_v18 = vld [vmem:[%s4326_s7 + $0x10] sm:$0xff] }
0x109f   : > { %v2407_v46 = vadd.f32 %v2406_v52, %v2328_v45  ;;  %v2695_v52 = vld [vmem:[%s4326_s7 + $0x8] sm:$0xff]  ;;  %v2697_v45 = vld [vmem:[%s4326_s7 + $0x18] sm:$0xff] }
0x10a1   : > { %v2415_v22 = vmul.f32 0.35355338, %v2407_v46  ;;  %v2313_v23 = vpop.permute.xlu1 %2312 }
0x10a2   : > { %v2317_v49 = vsel %vm915_vm9, %v2313_v23, 0.0  ;;  %vm4379_vm9 = vcmask 7168  }
0x10a3   : > { %v2319_v27 = vsel %vm3841_vm11, %v2317_v49, %v2307_v41  ;;  %v2417_v50 = vsel %vm4377_vm12, -10000.0, %v2415_v22  ;;  %vm4380_vm3 = vmmov %vm4379_vm9 }
0x10a4   : > { %v2412_v55 = vadd.f32 %v3268_v44, %v2319_v27  ;;  %v2419_v56 = vsel %vm1036_vm13, %v2417_v50, -inf  ;;  %v3591_v44 = vmov 0  }
0x10a5   : > { %2420 = vmax.xlane.f32.xlu0 %v2419_v56  ;;  %3532 = vset.pattern.permute.xlu1 %v3591_v44 }
0x10a6   : > { %v2416_v57 = vmul.f32 0.35355338, %v2412_v55  ;;  %3533 = vset.pattern.permute.xlu0 %v3591_v44 }
0x10a8   : > { %v2418_v59 = vsel %vm4378_vm15, -10000.0, %v2416_v57 }
0x10a9   : > { %v2422_v60 = vsel %vm1036_vm13, %v2418_v59, -inf }
0x10aa   : > { %2423 = vmax.xlane.f32.xlu1 %v2422_v60 }
0x1132   : > { %v2421_v62 = vpop.xlane.xlu0 %2420 }
0x1133   : > { %v2425_v63 = vsub.f32 %v2417_v50, %v2421_v62 }
0x1135   : > { %v2427_v1 = vmul.f32 1.442695, %v2425_v63 }
0x1137   : > { %3558 = vpow2.f32 %v2427_v1  ;;  %v2424_v2 = vpop.xlane.xlu1 %2423 }
0x1138   : > { %v2426_v61 = vsub.f32 %v2418_v59, %v2424_v2 }
0x113a   : > { %v2429_v3 = vmul.f32 1.442695, %v2426_v61  ;;  %v2692_v61 = vld [vmem:[%s4325_s6 + $0x10] sm:$0xff] }
0x113c   : > { %3560 = vpow2.f32 %v2429_v3  ;;  %v2693_v3 = vld [vmem:[%s4325_s6 + $0x18] sm:$0xff] }
0x1141   : > { %v3559_v38 = vpop.eup %3558 }
0x1142   : > { %v2431_v58 = vsel %vm1036_vm13, %v3559_v38, 0.0 }
0x1143   : > { %2432 = vadd.xlane.f32.xlu0 %v2431_v58 }
0x1146   : > { %v3561_v4 = vpop.eup %3560 }
0x1147   : > { %v2434_v6 = vsel %vm1036_vm13, %v3561_v4, 0.0 }
0x1148   : > { %2435 = vadd.xlane.f32.xlu0 %v2434_v6 }
0x11d0   : > { %v2433_v31 = vpop.xlane.xlu0 %2432 }
0x11d1   : > { %3562 = vrcp.f32 %v2433_v31 }
0x11d5   : > { %v2436_v7 = vpop.xlane.xlu0 %2435 }
0x11d6   : > { %3564 = vrcp.f32 %v2436_v7 }
0x11db   : > { %v3563_v11 = vpop.eup %3562 }
0x11dc   : > { %v2439_v12 = vmul.f32 %v3563_v11, %v3559_v38 }
0x11de   : > { %v2441_v13 = vsel %vm1036_vm13, %v2439_v12, 0.0 }
0x11df   : > { %2445 = vrot.lane.b32.xlu1 %v2441_v13, %s3578_s18 }
0x11e0   : > { %v3565_v14 = vpop.eup %3564 }
0x11e1   : > { %v2440_v16 = vmul.f32 %v3565_v14, %v3561_v4 }
0x11e3   : > { %v2442_v17 = vsel %vm1036_vm13, %v2440_v16, 0.0 }
0x11e4   : > { %2447 = vrot.lane.b32.xlu0 %v2442_v17, %s3578_s18  ;;  %s3590_s18 = smov 24  }
0x1251   : > { %v2446_v19 = vpop.permute.xlu1 %2445 }
0x1252   : > { %v2451_v21 = vsel %vm4379_vm9, 0.0, %v2446_v19 }
0x1253   : > { %v2453_v24 = vsel %vm3797_vm4, %v2451_v21, %v2441_v13  ;;  %vm4381_vm4 = vcmask 252928  }
0x1254   : > { %2457 = vrot.lane.b32.xlu1 %v2453_v24, %s3579_s21 }
0x1256   : > { %v2448_v26 = vpop.permute.xlu0 %2447 }
0x1257   : > { %v2452_v29 = vsel %vm4380_vm3, 0.0, %v2448_v26 }
0x1258   : > { %v2454_v32 = vsel %vm3805_vm5, %v2452_v29, %v2442_v17  ;;  %vm4382_vm5 = vmmov %vm4381_vm4 }
0x1259   : > { %2459 = vrot.lane.b32.xlu1 %v2454_v32, %s3579_s21 }
0x12c6   : > { %v2458_v34 = vpop.permute.xlu1 %2457 }
0x12c7   : > { %v2463_v35 = vsel %vm1082_vm14, 0.0, %v2458_v34 }
0x12c8   : > { %v2465_v36 = vsel %vm3813_vm7, %v2463_v35, %v2453_v24  ;;  %vm4383_vm7 = vcmask 261120  }
0x12c9   : > { %2469 = vrot.lane.b32.xlu0 %v2465_v36, %s3581_s15  ;;  %3291 = vmatprep.mubr.msk.f32.mxu0 %vm4383_vm7, %v2690_v53 }
0x12cb   : > { %v2460_v0 = vpop.permute.xlu1 %2459 }
0x12cc   : > { %v2464_v37 = vsel %vm1082_vm14, 0.0, %v2460_v0 }
0x12cd   : > { %v2466_v51 = vsel %vm3821_vm8, %v2464_v37, %v2454_v32  ;;  %vm2687_vm8 = vcmask 195584  }
0x12ce   : > { %2471 = vrot.lane.b32.xlu1 %v2466_v51, %s3581_s15 }
0x12d2   : > { %3513 = vrot.lane.b32.xlu1 %v3938_v33, %s3588_s30 }
0x12d6   : > { %3523 = vrot.lane.b32.xlu1 %v3522_v39, %s3589_s12 }
0x12da   : > { %2700 = vperm.xlu1 %3532, %v2694_v25  }
0x12de   : > { %2710 = vperm.xlu1 %3532, %v2696_v18  }
0x12e2   : > { %2715 = vperm.xlu1 %3532, %v2697_v45  }
0x133b   : > { %v2470_v5 = vpop.permute.xlu0 %2469 }
0x133c   : > { %v2475_v40 = vsel %vm1095_vm0, 0.0, %v2470_v5 }
0x133d   : > { %v2477_v10 = vsel %vm3829_vm10, %v2475_v40, %v2465_v36  ;;  %vm4384_vm10 = vmmov %vm4383_vm7 }
0x133e   : > { %2481 = vrot.lane.b32.xlu0 %v2477_v10, %s3583_s19 }
0x1340   : > { %v2472_v47 = vpop.permute.xlu1 %2471 }
0x1341   : > { %v2476_v41 = vsel %vm1095_vm0, 0.0, %v2472_v47 }
0x1342   : > { %3518 = vrot.lane.b32.xlu0 %v3517_v54, %s3583_s19  ;;  %v2478_v20 = vsel %vm3841_vm11, %v2476_v41, %v2466_v51  ;;  %vm3442_vm11 = vmpackc.low %vm4384_vm10, %vm4384_vm10 }
0x1344   : > { %v3514_v15 = vpop.permute.xlu1 %3513 }
0x1345   : > { %v3516_v48 = vunpack.i.h.bf16 %v3514_v15  ;;  %v3515_v28 = vunpack.i.l.bf16 %v3514_v15 }
0x1347   : > { %v3437_v33 = vpack.c.bf16 %v3516_v48, %v3515_v28 }
0x1348   : > { %v3524_v49 = vpop.permute.xlu1 %3523 }
0x1349   : > { %3438 = vmatprep.subr.bf16.mxu1 %v3437_v33  ;;  %v3526_v55 = vunpack.i.h.bf16 %v3524_v49  ;;  %v3525_v56 = vunpack.i.l.bf16 %v3524_v49 }
0x1359   : > { %v2701_v38 = vpop.permute.xlu1 %2700 }
0x135d   : > { %v2711_v58 = vpop.permute.xlu1 %2710 }
0x13b0   : > { %v2482_v42 = vpop.permute.xlu0 %2481 }
0x13b1   : > { %v2487_v43 = vsel %vm771_vm1, 0.0, %v2482_v42 }
0x13b2   : > { %3277 = vmatprep.mubr.msk.f32.mxu1 %vm4381_vm4, %v2487_v43 }
0x13b3   : > { %3278 = vmatmul.mubr.msk.f32.vlgmr.msra.gmra.mrb[18].mxu1 %vm4382_vm5, %v2478_v20 }
0x13b4   : > { %3440 = vmatpush3.bf16.msra.mxu1 %v3437_v33  ;;  %3284 = vmatprep.mubr.msk.f32.mxu1 %vm1036_vm13, %v2439_v12  ;;  %v3519_v46 = vpop.permute.xlu0 %3518  ;;  %v2716_v12 = vpop.permute.xlu1 %2715 }
0x13b5   : > { %v3521_v22 = vunpack.i.h.bf16 %v3519_v46  ;;  %v3520_v23 = vunpack.i.l.bf16 %v3519_v46 }
0x13b7   : > { %v2684_v27 = vsel %vm771_vm1, %v4005_v8, %v3521_v22  ;;  %v2683_v50 = vsel %vm771_vm1, %v4007_v9, %v3520_v23  ;;  %v2691_v9 = vld [vmem:[%s4325_s6 + $0x8] sm:$0xff]  ;;  %vm4385_vm1 = vmmov %vm4383_vm7 }
0x13b8   : > { %v2685_v62 = vsel %vm1036_vm13, %v2683_v50, %v3525_v56  ;;  %v2686_v63 = vsel %vm1036_vm13, %v2684_v27, %v3526_v55  ;;  %vm4386_vm14 = vmmov %vm4385_vm1 }
0x13b9   : > { %vm4387_vm0 = vmmov %vm4385_vm1 }
0x13bb   : > { %3285 = vmatmul.mubr.msk.f32.vlgmr.msra.gmra.mrb[18].mxu1 %vm1036_vm13, %v2440_v16 }
0x148e   : > { %v3286_v30 = vpop.f32.mrb[18].mxu1 }
0x148f   : > { %v2650_v54 = vpop.f32.mrb[19].mxu1 }
0x1490   : > { %v3527_v39 = vpack.i.bf16 %v3286_v30, %v2650_v54 }
0x1492   : > { %3528 = vrot.lane.b32.xlu0 %v3527_v39, %s3590_s18  ;;  %s426_s18 = scalar_lea.vmem %s4330_s11, %s3671_s23 }
0x1496   : > { %2705 = vperm.xlu0 %3533, %v2695_v52  }
0x1504   : > { %v3529_v57 = vpop.permute.xlu0 %3528 }
0x1505   : > { %v3531_v59 = vunpack.i.h.bf16 %v3529_v57  ;;  %v3530_v60 = vunpack.i.l.bf16 %v3529_v57 }
0x1507   : > { %v2688_v1 = vsel %vm2687_vm8, %v2685_v62, %v3530_v60  ;;  %v2689_v2 = vsel %vm2687_vm8, %v2686_v63, %v3531_v59 }
0x1508   : > { %v3441_v8 = vpack.c.bf16 %v2689_v2, %v2688_v1 }
0x150a   : > { %3443 = vmatprep.subr.msk.bf16.mxu0 %vm3442_vm11, %v3441_v8 }
0x150b   : > { %3446 = vmatpush3.bf16.xpose.msk.msra.mxu0 %vm3442_vm11, %v3441_v8 }
0x1512   : > { %3292 = vmatmul.mubr.msk.f32.vlgmr.msra.gmra.mrb[16].mxu0 %vm4385_vm1, %v2691_v9 }
0x1513   : > { %3294 = vmatprep.mubr.msk.f32.mxu0 %vm4386_vm14, %v2692_v61 }
0x1515   : > { %v2706_v4 = vpop.permute.xlu0 %2705 }
0x1516   : > { %3295 = vmatmul.mubr.msk.f32.gmra.mrb[18].mxu0 %vm4387_vm0, %v2693_v3 }
0x15e5   : > { %v3293_v6 = vpop.f32.mrb[16].mxu0 }
0x15e6   : > { %v2808_v31 = vadd.f32 %v3293_v6, %v2706_v4  ;;  %v2802_v7 = vpop.f32.mrb[17].mxu0 }
0x15e7   : > { %v2803_v11 = vadd.f32 %v2802_v7, %v2701_v38 }
0x15e8   : > { %2822 = vst.msk [vmem:[%s426_s18 + $0x8] sm:$0xff] %vm1036_vm13, %v2808_v31 }
0x15e9   : > { %2821 = vst.msk [vmem:[%s426_s18] sm:$0xff] %vm1036_vm13, %v2803_v11  ;;  %v3296_v13 = vpop.f32.mrb[18].mxu0 }
0x15ea   : > { %v2818_v14 = vadd.f32 %v3296_v13, %v2716_v12  ;;  %v2812_v16 = vpop.f32.mrb[19].mxu0 }
0x15eb   : > { %v2813_v17 = vadd.f32 %v2812_v16, %v2711_v58 }
0x15ec   : > { %2824 = vst.msk [vmem:[%s426_s18 + $0x18] sm:$0xff] %vm1036_vm13, %v2818_v14 }
0x15ed   : > { %2823 = vst.msk [vmem:[%s426_s18 + $0x10] sm:$0xff] %vm1036_vm13, %v2813_v17 }
0x15ee PF: > { %s21_s17 = sadd.s32 1, %s3572_s17  }
0x15ef   : > { %p18_p4 = scmp.ge.s32.totalorder %s21_s17, 4  }
0x15f1   :  { %20 = sbr.rel (!%p18_p4) target bundleno = 1 (0x1), region = 100 }

</bundles_post_ra>
